<compile_context>
chip_gen: v7x
topology: tpu7x:2x2x1
jax: 0.10.0
libtpu: 0.0.40
codegen_flags: <defaults>
</compile_context>

<pallas_src>
import jax
import jax.numpy as jnp
from jax.experimental import pallas as pl
from jax.experimental.pallas import tpu as pltpu

# ---------------- model hyper-parameters (small; ninp == nhid) --------------
NTOKEN  = 64          # vocab size
NINP    = 32          # embedding size
NHID    = 32          # hidden units per layer (4*NHID == 128 gate lanes)
NLAYERS = 2           # kernel wavefront is specialised to exactly 2 layers
SEQ     = 8
BATCH   = 2

B_PAD = 8             # pad batch to a full f32 sublane count
V_PAD = 128           # decoder output padded to a full lane width
G     = 4 * NHID      # 128: gate lanes per layer

# packed-parameter slab layout (rows x 256 lanes), all (8,128)-tile aligned:
#   rows   0: 64, lanes   0:256 -> fused recurrent weight [[whh0, wih1],[0, whh1]]
#   rows  64:128, lanes   0:128 -> layer-0 input-gate table  emb @ wih0 + b0
#   rows  64: 96, lanes 128:256 -> decoder weight (NHID, V_PAD)
#   row  128    , lanes   0:128 -> b1 ; lanes 128:256 -> decoder bias
WPK_BIAS_ROW = 2 * NHID + NTOKEN          # 128
WPK_ROWS     = WPK_BIAS_ROW + 8           # 136 (multiple of 8)


def _lstm_cell(gates, c):
    """One LSTM cell update. `gates` holds (i,f,g,o) pre-activations with the
    g block PRE-SCALED by 2, so tanh(g) == 2*sigmoid(2g) - 1 falls out of the
    single full-vreg sigmoid (one EUP pass per layer-step)."""
    sig = jax.nn.sigmoid(gates)
    i_g = sig[:, 0 * NHID:1 * NHID]
    f_g = sig[:, 1 * NHID:2 * NHID]
    g_g = 2.0 * sig[:, 2 * NHID:3 * NHID] - 1.0
    o_g = sig[:, 3 * NHID:4 * NHID]
    c_new = f_g * c + i_g * g_g
    h_new = o_g * jnp.tanh(c_new)
    return h_new, c_new


def rnn_lstm_kernel(tok_ref, hc0_ref, wpk_ref, dec_ref, hcn_ref, oh_ref, gx_ref):
    """tok: (T*B,) int32 in SMEM.   hc0: (L, Bp, 128) f32, lanes [h | c | pad].
       wpk: (136, 256) packed / pre-scaled parameter slab.
       dec: (Bp, V_PAD).            hcn: (L, Bp, 128) [h | c | pad]."""
    H = NHID

    # ---- unpack parameter slab (tile-aligned static slices, hoisted) -------
    w_fused = wpk_ref[0:2 * H, :]                        # (2H, 2G)
    emb_gx  = wpk_ref[2 * H:2 * H + NTOKEN, 0:G]         # (V, G) = emb@wih0 + b0
    w_dec   = wpk_ref[2 * H:3 * H, G:2 * G]              # (H, V_PAD)
    b1      = jnp.broadcast_to(                          # hoisted broadcast
        wpk_ref[WPK_BIAS_ROW:WPK_BIAS_ROW + 1, 0:G], (B_PAD, G))
    b_dec   = wpk_ref[WPK_BIAS_ROW:WPK_BIAS_ROW + 1, G:2 * G]   # (1, V_PAD)

    # ---- fused embedding gather: one-hot rows -> one MXU matmul ------------
    oh_ref[...] = jnp.zeros_like(oh_ref)                 # padded rows stay 0
    lane_iota = jax.lax.broadcasted_iota(jnp.int32, (1, NTOKEN), 1)
    for t in range(SEQ):
        for b in range(BATCH):
            tok = tok_ref[t * BATCH + b]
            r = t * B_PAD + b
            oh_ref[r:r + 1, :] = (lane_iota == tok).astype(jnp.float32)
    # layer-0 input gates for ALL time steps (bias already folded into table)
    gx_ref[...] = jnp.dot(oh_ref[...], emb_gx,
                          preferred_element_type=jnp.float32)    # (T*Bp, G)

    # ---- initial state (lanes: [h | c | pad]) -------------------------------
    hc_l0 = hc0_ref[0]
    hc_l1 = hc0_ref[1]
    h0, c0 = hc_l0[:, 0:H], hc_l0[:, H:2 * H]
    h1, c1 = hc_l1[:, 0:H], hc_l1[:, H:2 * H]

    # ---- wavefront over both layers: T + L - 1 = 9 steps --------------------
    # step w: layer 0 advances to time w (if w < T); layer 1 consumes layer-0's
    # output of time w-1 (if w >= 1).  Both recurrent matmuls are fused into a
    # single (Bp,2H)@(2H,8H) MXU call on the pre-update state snapshot.
    for w in range(SEQ + 1):
        hh = jnp.concatenate([h0, h1], axis=1)                        # (Bp, 2H)
        g2 = jnp.dot(hh, w_fused, preferred_element_type=jnp.float32)  # (Bp, 2G)
        if w < SEQ:
            gates0 = g2[:, 0:G] + gx_ref[w * B_PAD:(w + 1) * B_PAD, :]
            h0, c0 = _lstm_cell(gates0, c0)
        if w >= 1:
            gates1 = g2[:, G:2 * G] + b1
            h1, c1 = _lstm_cell(gates1, c1)

    # ---- decoder on the last top-layer output (lane-dense 128-wide store) --
    dec_ref[...] = jnp.dot(h1, w_dec, preferred_element_type=jnp.float32) + b_dec

    # ---- lane-dense packed state writeback; zero padded batch rows ---------
    row_mask = (jax.lax.broadcasted_iota(jnp.int32, (B_PAD, 1), 0)
                < BATCH).astype(jnp.float32)
    zpad = jnp.zeros((B_PAD, 2 * H), jnp.float32)
    hcn_ref[0] = jnp.concatenate([h0, c0, zpad], axis=1) * row_mask
    hcn_ref[1] = jnp.concatenate([h1, c1, zpad], axis=1) * row_mask


def rnn_model_forward(tokens, hidden_packed, wpk):
    """tokens: (T, B) int32.  hidden_packed: (L, B_PAD, 4H) f32, [h | c | pad].
       Returns (decoded (B, NTOKEN), next packed hidden)."""
    tok_flat = tokens.reshape(SEQ * BATCH).astype(jnp.int32)
    vmem = pl.BlockSpec(memory_space=pltpu.MemorySpace.VMEM)
    dec_p, hcn = pl.pallas_call(
        rnn_lstm_kernel,
        out_shape=(
            jax.ShapeDtypeStruct((B_PAD, V_PAD), jnp.float32),
            jax.ShapeDtypeStruct((NLAYERS, B_PAD, G), jnp.float32),
        ),
        in_specs=[
            pl.BlockSpec(memory_space=pltpu.MemorySpace.SMEM),   # tokens
            vmem,                                                # packed state
            vmem,                                                # packed params
        ],
        out_specs=(vmem, vmem),
        scratch_shapes=[
            pltpu.VMEM((SEQ * B_PAD, NTOKEN), jnp.float32),      # one-hot tokens
            pltpu.VMEM((SEQ * B_PAD, G), jnp.float32),           # hoisted layer-0 gates
        ],
    )(tok_flat, hidden_packed, wpk)
    return dec_p[:BATCH, :NTOKEN], hcn


# ------------------------------ parameters ----------------------------------
def make_params(key):
    """Raw (unscaled, unpacked) parameters mirroring RNNModel.__init__."""
    ks = jax.random.split(key, 6)
    initrange = 0.1
    stdv = 1.0 / (NHID ** 0.5)                 # PyTorch LSTM default init range
    emb  = jax.random.uniform(ks[0], (NTOKEN, NINP), jnp.float32, -initrange, initrange)
    wih  = jax.random.uniform(ks[1], (NLAYERS, NINP, 4 * NHID), jnp.float32, -stdv, stdv)
    whh  = jax.random.uniform(ks[2], (NLAYERS, NHID, 4 * NHID), jnp.float32, -stdv, stdv)
    b_ih = jax.random.uniform(ks[3], (NLAYERS, 4 * NHID), jnp.float32, -stdv, stdv)
    b_hh = jax.random.uniform(ks[4], (NLAYERS, 4 * NHID), jnp.float32, -stdv, stdv)
    wdec = jax.random.uniform(ks[5], (NHID, NTOKEN), jnp.float32, -initrange, initrange)
    bdec = jnp.zeros((NTOKEN,), jnp.float32)   # decoder.bias.fill_(0)
    return dict(emb=emb, wih=wih, whh=whh, b=b_ih + b_hh, wdec=wdec, bdec=bdec)


def pack_params(p):
    """One contiguous pre-scaled f32 slab -> a single weight DMA for the kernel."""
    H = NHID
    hi = jax.lax.Precision.HIGHEST

    def gscale(w):   # pre-double the g-gate pre-activation (tanh-as-sigmoid trick)
        return w.at[..., 2 * H:3 * H].multiply(2.0)

    wih0, wih1 = gscale(p["wih"][0]), gscale(p["wih"][1])
    whh0, whh1 = gscale(p["whh"][0]), gscale(p["whh"][1])
    b0,   b1   = gscale(p["b"][0]),   gscale(p["b"][1])

    # embedding lookup fused with the layer-0 input projection:
    #   gx0(token) = emb[token] @ wih0 + b0  == one row of this table.
    emb_gx = jnp.dot(p["emb"], wih0, precision=hi) + b0[None, :]

    wpk = jnp.zeros((WPK_ROWS, 2 * G), jnp.float32)
    wpk = wpk.at[0:H, 0:G].set(whh0)                        # [[whh0, wih1],
    wpk = wpk.at[0:H, G:2 * G].set(wih1)                    #  [  0 , whh1]]
    wpk = wpk.at[H:2 * H, G:2 * G].set(whh1)
    wpk = wpk.at[2 * H:2 * H + NTOKEN, 0:G].set(emb_gx)
    wpk = wpk.at[2 * H:3 * H, G:G + NTOKEN].set(p["wdec"])
    wpk = wpk.at[WPK_BIAS_ROW, 0:G].set(b1)
    wpk = wpk.at[WPK_BIAS_ROW, G:G + NTOKEN].set(p["bdec"])
    return wpk


def pack_hidden(h0, c0):
    """(L, B, H) h/c -> lane-dense packed kernel state (L, B_PAD, 4H) [h|c|pad]."""
    hc = jnp.zeros((NLAYERS, B_PAD, G), jnp.float32)
    hc = hc.at[:, :BATCH, 0:NHID].set(h0)
    hc = hc.at[:, :BATCH, NHID:2 * NHID].set(c0)
    return hc


# ------------------------------ reference -----------------------------------
def ref_forward(tokens, h0, c0, p):
    """Pure-JAX reference matching PyTorch LSTM / Linear semantics."""
    hi = jax.lax.Precision.HIGHEST
    x = p["emb"][tokens]                                   # (T, B, H)
    hs, cs = [], []
    for l in range(NLAYERS):
        h, c = h0[l], c0[l]
        outs = []
        for t in range(SEQ):
            gates = (jnp.dot(x[t], p["wih"][l], precision=hi)
                     + jnp.dot(h, p["whh"][l], precision=hi) + p["b"][l])
            i_g = jax.nn.sigmoid(gates[:, 0 * NHID:1 * NHID])
            f_g = jax.nn.sigmoid(gates[:, 1 * NHID:2 * NHID])
            g_g = jnp.tanh(gates[:, 2 * NHID:3 * NHID])
            o_g = jax.nn.sigmoid(gates[:, 3 * NHID:4 * NHID])
            c = f_g * c + i_g * g_g
            h = o_g * jnp.tanh(c)
            outs.append(h)
        x = jnp.stack(outs)
        hs.append(h)
        cs.append(c)
    dec = jnp.dot(x[-1], p["wdec"], precision=hi) + p["bdec"]
    return dec, jnp.stack(hs), jnp.stack(cs)


if __name__ == "__main__":
    key = jax.random.PRNGKey(0)
    k_tok, k_par = jax.random.split(key)

    params = make_params(k_par)
    wpk = pack_params(params)
    tokens = jax.random.randint(k_tok, (SEQ, BATCH), 0, NTOKEN, dtype=jnp.int32)
    # init_hidden(bsz): zeros, stored in the packed lane-dense layout
    h0 = jnp.zeros((NLAYERS, BATCH, NHID), jnp.float32)
    c0 = jnp.zeros((NLAYERS, BATCH, NHID), jnp.float32)
    hidden = pack_hidden(h0, c0)

    fwd = jax.jit(rnn_model_forward)
    decoded, hidden_next = fwd(tokens, hidden, wpk)
    decoded = jax.block_until_ready(decoded)
    hidden_next = jax.block_until_ready(hidden_next)

    h_n = hidden_next[:, :BATCH, 0:NHID]
    c_n = hidden_next[:, :BATCH, NHID:2 * NHID]

    # correctness check against the pure-JAX reference
    dec_r, hn_r, cn_r = ref_forward(tokens, h0, c0, params)
    assert decoded.shape == (BATCH, NTOKEN)
    assert jnp.allclose(decoded, dec_r, atol=1e-4, rtol=1e-4)
    assert jnp.allclose(h_n, hn_r, atol=1e-4, rtol=1e-4)
    assert jnp.allclose(c_n, cn_r, atol=1e-4, rtol=1e-4)
    # padded rows of the packed state stay exactly zero (safe to feed back)
    assert jnp.all(hidden_next[:, BATCH:, :] == 0.0)

    print("KERNEL_OK")
</pallas_src>

<mosaic_0001>
module attributes {stable_mosaic.version = 11 : i64} {
  func.func @rnn_lstm_kernel(%arg0: memref<16xi32, #tpu.memory_space<smem>>, %arg1: memref<2x8x128xf32, #tpu.memory_space<vmem>>, %arg2: memref<136x256xf32, #tpu.memory_space<vmem>>, %arg3: memref<8x128xf32, #tpu.memory_space<vmem>>, %arg4: memref<2x8x128xf32, #tpu.memory_space<vmem>>, %arg5: memref<64x64xf32, #tpu.memory_space<vmem>>, %arg6: memref<64x128xf32, #tpu.memory_space<vmem>>) attributes {dimension_semantics = [], scalar_prefetch = 0 : i64, scratch_operands = 2 : i64, tpu.core_type = #tpu.core_type<tc>} {
    %c0 = arith.constant 0 : index
    %c0_0 = arith.constant 0 : index
    %0 = vector.load %arg2[%c0, %c0_0] : memref<136x256xf32, #tpu.memory_space<vmem>>, vector<64x256xf32>
    %c64 = arith.constant 64 : index
    %c0_1 = arith.constant 0 : index
    %1 = vector.load %arg2[%c64, %c0_1] : memref<136x256xf32, #tpu.memory_space<vmem>>, vector<64x128xf32>
    %c64_2 = arith.constant 64 : index
    %c128 = arith.constant 128 : index
    %2 = vector.load %arg2[%c64_2, %c128] : memref<136x256xf32, #tpu.memory_space<vmem>>, vector<32x128xf32>
    %c128_3 = arith.constant 128 : index
    %c0_4 = arith.constant 0 : index
    %3 = vector.load %arg2[%c128_3, %c0_4] : memref<136x256xf32, #tpu.memory_space<vmem>>, vector<1x128xf32>
    %4 = vector.shape_cast %3 : vector<1x128xf32> to vector<1x128xf32>
    %5 = vector.broadcast %4 : vector<1x128xf32> to vector<8x128xf32>
    %c128_5 = arith.constant 128 : index
    %c128_6 = arith.constant 128 : index
    %6 = vector.load %arg2[%c128_5, %c128_6] : memref<136x256xf32, #tpu.memory_space<vmem>>, vector<1x128xf32>
    %cst = arith.constant 0.000000e+00 : f32
    %7 = vector.broadcast %cst : f32 to vector<64x64xf32>
    %c0_7 = arith.constant 0 : index
    %c0_8 = arith.constant 0 : index
    %8 = vector.load %arg5[%c0_7, %c0_8] : memref<64x64xf32, #tpu.memory_space<vmem>>, vector<64x64xf32>
    tpu.vector_store %arg5[%c0_7, %c0_8], %7 {strides = array<i32>} : memref<64x64xf32, #tpu.memory_space<vmem>>, vector<64x64xf32>,
    %9 = tpu.iota {dimensions = array<i32: 1>} : vector<1x64xi32>
    %c0_9 = arith.constant 0 : index
    %10 = memref.load %arg0[%c0_9] : memref<16xi32, #tpu.memory_space<smem>>
    %11 = vector.broadcast %10 : i32 to vector<1x64xi32>
    %12 = arith.cmpi eq, %9, %11 : vector<1x64xi32>
    %13 = arith.extui %12 : vector<1x64xi1> to vector<1x64xi32>
    %14 = arith.sitofp %13 : vector<1x64xi32> to vector<1x64xf32>
    %c0_10 = arith.constant 0 : index
    %c0_11 = arith.constant 0 : index
    %15 = vector.load %arg5[%c0_10, %c0_11] : memref<64x64xf32, #tpu.memory_space<vmem>>, vector<1x64xf32>
    tpu.vector_store %arg5[%c0_10, %c0_11], %14 {strides = array<i32>} : memref<64x64xf32, #tpu.memory_space<vmem>>, vector<1x64xf32>,
    %c1 = arith.constant 1 : index
    %16 = memref.load %arg0[%c1] : memref<16xi32, #tpu.memory_space<smem>>
    %17 = vector.broadcast %16 : i32 to vector<1x64xi32>
    %18 = arith.cmpi eq, %9, %17 : vector<1x64xi32>
    %19 = arith.extui %18 : vector<1x64xi1> to vector<1x64xi32>
    %20 = arith.sitofp %19 : vector<1x64xi32> to vector<1x64xf32>
    %c1_12 = arith.constant 1 : index
    %c0_13 = arith.constant 0 : index
    %21 = vector.load %arg5[%c1_12, %c0_13] : memref<64x64xf32, #tpu.memory_space<vmem>>, vector<1x64xf32>
    tpu.vector_store %arg5[%c1_12, %c0_13], %20 {strides = array<i32>} : memref<64x64xf32, #tpu.memory_space<vmem>>, vector<1x64xf32>,
    %c2 = arith.constant 2 : index
    %22 = memref.load %arg0[%c2] : memref<16xi32, #tpu.memory_space<smem>>
    %23 = vector.broadcast %22 : i32 to vector<1x64xi32>
    %24 = arith.cmpi eq, %9, %23 : vector<1x64xi32>
    %25 = arith.extui %24 : vector<1x64xi1> to vector<1x64xi32>
    %26 = arith.sitofp %25 : vector<1x64xi32> to vector<1x64xf32>
    %c8 = arith.constant 8 : index
    %c0_14 = arith.constant 0 : index
    %27 = vector.load %arg5[%c8, %c0_14] : memref<64x64xf32, #tpu.memory_space<vmem>>, vector<1x64xf32>
    tpu.vector_store %arg5[%c8, %c0_14], %26 {strides = array<i32>} : memref<64x64xf32, #tpu.memory_space<vmem>>, vector<1x64xf32>,
    %c3 = arith.constant 3 : index
    %28 = memref.load %arg0[%c3] : memref<16xi32, #tpu.memory_space<smem>>
    %29 = vector.broadcast %28 : i32 to vector<1x64xi32>
    %30 = arith.cmpi eq, %9, %29 : vector<1x64xi32>
    %31 = arith.extui %30 : vector<1x64xi1> to vector<1x64xi32>
    %32 = arith.sitofp %31 : vector<1x64xi32> to vector<1x64xf32>
    %c9 = arith.constant 9 : index
    %c0_15 = arith.constant 0 : index
    %33 = vector.load %arg5[%c9, %c0_15] : memref<64x64xf32, #tpu.memory_space<vmem>>, vector<1x64xf32>
    tpu.vector_store %arg5[%c9, %c0_15], %32 {strides = array<i32>} : memref<64x64xf32, #tpu.memory_space<vmem>>, vector<1x64xf32>,
    %c4 = arith.constant 4 : index
    %34 = memref.load %arg0[%c4] : memref<16xi32, #tpu.memory_space<smem>>
    %35 = vector.broadcast %34 : i32 to vector<1x64xi32>
    %36 = arith.cmpi eq, %9, %35 : vector<1x64xi32>
    %37 = arith.extui %36 : vector<1x64xi1> to vector<1x64xi32>
    %38 = arith.sitofp %37 : vector<1x64xi32> to vector<1x64xf32>
    %c16 = arith.constant 16 : index
    %c0_16 = arith.constant 0 : index
    %39 = vector.load %arg5[%c16, %c0_16] : memref<64x64xf32, #tpu.memory_space<vmem>>, vector<1x64xf32>
    tpu.vector_store %arg5[%c16, %c0_16], %38 {strides = array<i32>} : memref<64x64xf32, #tpu.memory_space<vmem>>, vector<1x64xf32>,
    %c5 = arith.constant 5 : index
    %40 = memref.load %arg0[%c5] : memref<16xi32, #tpu.memory_space<smem>>
    %41 = vector.broadcast %40 : i32 to vector<1x64xi32>
    %42 = arith.cmpi eq, %9, %41 : vector<1x64xi32>
    %43 = arith.extui %42 : vector<1x64xi1> to vector<1x64xi32>
    %44 = arith.sitofp %43 : vector<1x64xi32> to vector<1x64xf32>
    %c17 = arith.constant 17 : index
    %c0_17 = arith.constant 0 : index
    %45 = vector.load %arg5[%c17, %c0_17] : memref<64x64xf32, #tpu.memory_space<vmem>>, vector<1x64xf32>
    tpu.vector_store %arg5[%c17, %c0_17], %44 {strides = array<i32>} : memref<64x64xf32, #tpu.memory_space<vmem>>, vector<1x64xf32>,
    %c6 = arith.constant 6 : index
    %46 = memref.load %arg0[%c6] : memref<16xi32, #tpu.memory_space<smem>>
    %47 = vector.broadcast %46 : i32 to vector<1x64xi32>
    %48 = arith.cmpi eq, %9, %47 : vector<1x64xi32>
    %49 = arith.extui %48 : vector<1x64xi1> to vector<1x64xi32>
    %50 = arith.sitofp %49 : vector<1x64xi32> to vector<1x64xf32>
    %c24 = arith.constant 24 : index
    %c0_18 = arith.constant 0 : index
    %51 = vector.load %arg5[%c24, %c0_18] : memref<64x64xf32, #tpu.memory_space<vmem>>, vector<1x64xf32>
    tpu.vector_store %arg5[%c24, %c0_18], %50 {strides = array<i32>} : memref<64x64xf32, #tpu.memory_space<vmem>>, vector<1x64xf32>,
    %c7 = arith.constant 7 : index
    %52 = memref.load %arg0[%c7] : memref<16xi32, #tpu.memory_space<smem>>
    %53 = vector.broadcast %52 : i32 to vector<1x64xi32>
    %54 = arith.cmpi eq, %9, %53 : vector<1x64xi32>
    %55 = arith.extui %54 : vector<1x64xi1> to vector<1x64xi32>
    %56 = arith.sitofp %55 : vector<1x64xi32> to vector<1x64xf32>
    %c25 = arith.constant 25 : index
    %c0_19 = arith.constant 0 : index
    %57 = vector.load %arg5[%c25, %c0_19] : memref<64x64xf32, #tpu.memory_space<vmem>>, vector<1x64xf32>
    tpu.vector_store %arg5[%c25, %c0_19], %56 {strides = array<i32>} : memref<64x64xf32, #tpu.memory_space<vmem>>, vector<1x64xf32>,
    %c8_20 = arith.constant 8 : index
    %58 = memref.load %arg0[%c8_20] : memref<16xi32, #tpu.memory_space<smem>>
    %59 = vector.broadcast %58 : i32 to vector<1x64xi32>
    %60 = arith.cmpi eq, %9, %59 : vector<1x64xi32>
    %61 = arith.extui %60 : vector<1x64xi1> to vector<1x64xi32>
    %62 = arith.sitofp %61 : vector<1x64xi32> to vector<1x64xf32>
    %c32 = arith.constant 32 : index
    %c0_21 = arith.constant 0 : index
    %63 = vector.load %arg5[%c32, %c0_21] : memref<64x64xf32, #tpu.memory_space<vmem>>, vector<1x64xf32>
    tpu.vector_store %arg5[%c32, %c0_21], %62 {strides = array<i32>} : memref<64x64xf32, #tpu.memory_space<vmem>>, vector<1x64xf32>,
    %c9_22 = arith.constant 9 : index
    %64 = memref.load %arg0[%c9_22] : memref<16xi32, #tpu.memory_space<smem>>
    %65 = vector.broadcast %64 : i32 to vector<1x64xi32>
    %66 = arith.cmpi eq, %9, %65 : vector<1x64xi32>
    %67 = arith.extui %66 : vector<1x64xi1> to vector<1x64xi32>
    %68 = arith.sitofp %67 : vector<1x64xi32> to vector<1x64xf32>
    %c33 = arith.constant 33 : index
    %c0_23 = arith.constant 0 : index
    %69 = vector.load %arg5[%c33, %c0_23] : memref<64x64xf32, #tpu.memory_space<vmem>>, vector<1x64xf32>
    tpu.vector_store %arg5[%c33, %c0_23], %68 {strides = array<i32>} : memref<64x64xf32, #tpu.memory_space<vmem>>, vector<1x64xf32>,
    %c10 = arith.constant 10 : index
    %70 = memref.load %arg0[%c10] : memref<16xi32, #tpu.memory_space<smem>>
    %71 = vector.broadcast %70 : i32 to vector<1x64xi32>
    %72 = arith.cmpi eq, %9, %71 : vector<1x64xi32>
    %73 = arith.extui %72 : vector<1x64xi1> to vector<1x64xi32>
    %74 = arith.sitofp %73 : vector<1x64xi32> to vector<1x64xf32>
    %c40 = arith.constant 40 : index
    %c0_24 = arith.constant 0 : index
    %75 = vector.load %arg5[%c40, %c0_24] : memref<64x64xf32, #tpu.memory_space<vmem>>, vector<1x64xf32>
    tpu.vector_store %arg5[%c40, %c0_24], %74 {strides = array<i32>} : memref<64x64xf32, #tpu.memory_space<vmem>>, vector<1x64xf32>,
    %c11 = arith.constant 11 : index
    %76 = memref.load %arg0[%c11] : memref<16xi32, #tpu.memory_space<smem>>
    %77 = vector.broadcast %76 : i32 to vector<1x64xi32>
    %78 = arith.cmpi eq, %9, %77 : vector<1x64xi32>
    %79 = arith.extui %78 : vector<1x64xi1> to vector<1x64xi32>
    %80 = arith.sitofp %79 : vector<1x64xi32> to vector<1x64xf32>
    %c41 = arith.constant 41 : index
    %c0_25 = arith.constant 0 : index
    %81 = vector.load %arg5[%c41, %c0_25] : memref<64x64xf32, #tpu.memory_space<vmem>>, vector<1x64xf32>
    tpu.vector_store %arg5[%c41, %c0_25], %80 {strides = array<i32>} : memref<64x64xf32, #tpu.memory_space<vmem>>, vector<1x64xf32>,
    %c12 = arith.constant 12 : index
    %82 = memref.load %arg0[%c12] : memref<16xi32, #tpu.memory_space<smem>>
    %83 = vector.broadcast %82 : i32 to vector<1x64xi32>
    %84 = arith.cmpi eq, %9, %83 : vector<1x64xi32>
    %85 = arith.extui %84 : vector<1x64xi1> to vector<1x64xi32>
    %86 = arith.sitofp %85 : vector<1x64xi32> to vector<1x64xf32>
    %c48 = arith.constant 48 : index
    %c0_26 = arith.constant 0 : index
    %87 = vector.load %arg5[%c48, %c0_26] : memref<64x64xf32, #tpu.memory_space<vmem>>, vector<1x64xf32>
    tpu.vector_store %arg5[%c48, %c0_26], %86 {strides = array<i32>} : memref<64x64xf32, #tpu.memory_space<vmem>>, vector<1x64xf32>,
    %c13 = arith.constant 13 : index
    %88 = memref.load %arg0[%c13] : memref<16xi32, #tpu.memory_space<smem>>
    %89 = vector.broadcast %88 : i32 to vector<1x64xi32>
    %90 = arith.cmpi eq, %9, %89 : vector<1x64xi32>
    %91 = arith.extui %90 : vector<1x64xi1> to vector<1x64xi32>
    %92 = arith.sitofp %91 : vector<1x64xi32> to vector<1x64xf32>
    %c49 = arith.constant 49 : index
    %c0_27 = arith.constant 0 : index
    %93 = vector.load %arg5[%c49, %c0_27] : memref<64x64xf32, #tpu.memory_space<vmem>>, vector<1x64xf32>
    tpu.vector_store %arg5[%c49, %c0_27], %92 {strides = array<i32>} : memref<64x64xf32, #tpu.memory_space<vmem>>, vector<1x64xf32>,
    %c14 = arith.constant 14 : index
    %94 = memref.load %arg0[%c14] : memref<16xi32, #tpu.memory_space<smem>>
    %95 = vector.broadcast %94 : i32 to vector<1x64xi32>
    %96 = arith.cmpi eq, %9, %95 : vector<1x64xi32>
    %97 = arith.extui %96 : vector<1x64xi1> to vector<1x64xi32>
    %98 = arith.sitofp %97 : vector<1x64xi32> to vector<1x64xf32>
    %c56 = arith.constant 56 : index
    %c0_28 = arith.constant 0 : index
    %99 = vector.load %arg5[%c56, %c0_28] : memref<64x64xf32, #tpu.memory_space<vmem>>, vector<1x64xf32>
    tpu.vector_store %arg5[%c56, %c0_28], %98 {strides = array<i32>} : memref<64x64xf32, #tpu.memory_space<vmem>>, vector<1x64xf32>,
    %c15 = arith.constant 15 : index
    %100 = memref.load %arg0[%c15] : memref<16xi32, #tpu.memory_space<smem>>
    %101 = vector.broadcast %100 : i32 to vector<1x64xi32>
    %102 = arith.cmpi eq, %9, %101 : vector<1x64xi32>
    %103 = arith.extui %102 : vector<1x64xi1> to vector<1x64xi32>
    %104 = arith.sitofp %103 : vector<1x64xi32> to vector<1x64xf32>
    %c57 = arith.constant 57 : index
    %c0_29 = arith.constant 0 : index
    %105 = vector.load %arg5[%c57, %c0_29] : memref<64x64xf32, #tpu.memory_space<vmem>>, vector<1x64xf32>
    tpu.vector_store %arg5[%c57, %c0_29], %104 {strides = array<i32>} : memref<64x64xf32, #tpu.memory_space<vmem>>, vector<1x64xf32>,
    %c0_30 = arith.constant 0 : index
    %c0_31 = arith.constant 0 : index
    %106 = vector.load %arg5[%c0_30, %c0_31] : memref<64x64xf32, #tpu.memory_space<vmem>>, vector<64x64xf32>
    %cst_32 = arith.constant dense<0.000000e+00> : vector<64x128xf32>
    %107 = tpu.matmul %106, %1, %cst_32 {dimension_numbers = #tpu.dot_dimension_numbers<[1], [0], [0], [1], [0, 0, 1, 1], [], []>} : vector<64x64xf32>, vector<64x128xf32>, vector<64x128xf32> -> vector<64x128xf32>
    %c0_33 = arith.constant 0 : index
    %c0_34 = arith.constant 0 : index
    %108 = vector.load %arg6[%c0_33, %c0_34] : memref<64x128xf32, #tpu.memory_space<vmem>>, vector<64x128xf32>
    tpu.vector_store %arg6[%c0_33, %c0_34], %107 {strides = array<i32>} : memref<64x128xf32, #tpu.memory_space<vmem>>, vector<64x128xf32>,
    %c0_35 = arith.constant 0 : index
    %c0_36 = arith.constant 0 : index
    %c0_37 = arith.constant 0 : index
    %109 = vector.load %arg1[%c0_35, %c0_36, %c0_37] : memref<2x8x128xf32, #tpu.memory_space<vmem>>, vector<1x8x128xf32>
    %110 = vector.shape_cast %109 : vector<1x8x128xf32> to vector<8x128xf32>
    %c1_38 = arith.constant 1 : index
    %c0_39 = arith.constant 0 : index
    %c0_40 = arith.constant 0 : index
    %111 = vector.load %arg1[%c1_38, %c0_39, %c0_40] : memref<2x8x128xf32, #tpu.memory_space<vmem>>, vector<1x8x128xf32>
    %112 = vector.shape_cast %111 : vector<1x8x128xf32> to vector<8x128xf32>
    %113 = vector.extract_strided_slice %110 {offsets = [0, 0], sizes = [8, 32], strides = [1, 1]} : vector<8x128xf32> to vector<8x32xf32>
    %114 = vector.extract_strided_slice %110 {offsets = [0, 32], sizes = [8, 32], strides = [1, 1]} : vector<8x128xf32> to vector<8x32xf32>
    %115 = vector.extract_strided_slice %112 {offsets = [0, 0], sizes = [8, 32], strides = [1, 1]} : vector<8x128xf32> to vector<8x32xf32>
    %116 = vector.extract_strided_slice %112 {offsets = [0, 32], sizes = [8, 32], strides = [1, 1]} : vector<8x128xf32> to vector<8x32xf32>
    %117 = tpu.concatenate %113, %115 in 1 : vector<8x32xf32>, vector<8x32xf32> -> vector<8x64xf32>
    %cst_41 = arith.constant dense<0.000000e+00> : vector<8x256xf32>
    %118 = tpu.matmul %117, %0, %cst_41 {dimension_numbers = #tpu.dot_dimension_numbers<[1], [0], [0], [1], [0, 0, 1, 1], [], []>} : vector<8x64xf32>, vector<64x256xf32>, vector<8x256xf32> -> vector<8x256xf32>
    %119 = vector.extract_strided_slice %118 {offsets = [0, 0], sizes = [8, 128], strides = [1, 1]} : vector<8x256xf32> to vector<8x128xf32>
    %c0_42 = arith.constant 0 : index
    %c0_43 = arith.constant 0 : index
    %120 = vector.load %arg6[%c0_42, %c0_43] : memref<64x128xf32, #tpu.memory_space<vmem>>, vector<8x128xf32>
    %121 = arith.addf %119, %120 : vector<8x128xf32>
    %122 = arith.negf %121 : vector<8x128xf32>
    %123 = math.exp %122 : vector<8x128xf32>
    %cst_44 = arith.constant 1.000000e+00 : f32
    %124 = vector.broadcast %cst_44 : f32 to vector<8x128xf32>
    %125 = arith.addf %124, %123 : vector<8x128xf32>
    %126 = arith.divf %124, %125 : vector<8x128xf32>
    %127 = vector.extract_strided_slice %126 {offsets = [0, 0], sizes = [8, 32], strides = [1, 1]} : vector<8x128xf32> to vector<8x32xf32>
    %128 = vector.extract_strided_slice %126 {offsets = [0, 32], sizes = [8, 32], strides = [1, 1]} : vector<8x128xf32> to vector<8x32xf32>
    %129 = vector.extract_strided_slice %126 {offsets = [0, 64], sizes = [8, 32], strides = [1, 1]} : vector<8x128xf32> to vector<8x32xf32>
    %cst_45 = arith.constant 2.000000e+00 : f32
    %130 = vector.broadcast %cst_45 : f32 to vector<8x32xf32>
    %131 = arith.mulf %130, %129 : vector<8x32xf32>
    %cst_46 = arith.constant 1.000000e+00 : f32
    %132 = vector.broadcast %cst_46 : f32 to vector<8x32xf32>
    %133 = arith.subf %131, %132 : vector<8x32xf32>
    %134 = vector.extract_strided_slice %126 {offsets = [0, 96], sizes = [8, 32], strides = [1, 1]} : vector<8x128xf32> to vector<8x32xf32>
    %135 = arith.mulf %128, %114 : vector<8x32xf32>
    %136 = arith.mulf %127, %133 : vector<8x32xf32>
    %137 = arith.addf %135, %136 : vector<8x32xf32>
    %138 = math.tanh %137 : vector<8x32xf32>
    %139 = arith.mulf %134, %138 : vector<8x32xf32>
    %140 = tpu.concatenate %139, %115 in 1 : vector<8x32xf32>, vector<8x32xf32> -> vector<8x64xf32>
    %cst_47 = arith.constant dense<0.000000e+00> : vector<8x256xf32>
    %141 = tpu.matmul %140, %0, %cst_47 {dimension_numbers = #tpu.dot_dimension_numbers<[1], [0], [0], [1], [0, 0, 1, 1], [], []>} : vector<8x64xf32>, vector<64x256xf32>, vector<8x256xf32> -> vector<8x256xf32>
    %142 = vector.extract_strided_slice %141 {offsets = [0, 0], sizes = [8, 128], strides = [1, 1]} : vector<8x256xf32> to vector<8x128xf32>
    %c8_48 = arith.constant 8 : index
    %c0_49 = arith.constant 0 : index
    %143 = vector.load %arg6[%c8_48, %c0_49] : memref<64x128xf32, #tpu.memory_space<vmem>>, vector<8x128xf32>
    %144 = arith.addf %142, %143 : vector<8x128xf32>
    %145 = arith.negf %144 : vector<8x128xf32>
    %146 = math.exp %145 : vector<8x128xf32>
    %cst_50 = arith.constant 1.000000e+00 : f32
    %147 = vector.broadcast %cst_50 : f32 to vector<8x128xf32>
    %148 = arith.addf %147, %146 : vector<8x128xf32>
    %149 = arith.divf %147, %148 : vector<8x128xf32>
    %150 = vector.extract_strided_slice %149 {offsets = [0, 0], sizes = [8, 32], strides = [1, 1]} : vector<8x128xf32> to vector<8x32xf32>
    %151 = vector.extract_strided_slice %149 {offsets = [0, 32], sizes = [8, 32], strides = [1, 1]} : vector<8x128xf32> to vector<8x32xf32>
    %152 = vector.extract_strided_slice %149 {offsets = [0, 64], sizes = [8, 32], strides = [1, 1]} : vector<8x128xf32> to vector<8x32xf32>
    %cst_51 = arith.constant 2.000000e+00 : f32
    %153 = vector.broadcast %cst_51 : f32 to vector<8x32xf32>
    %154 = arith.mulf %153, %152 : vector<8x32xf32>
    %cst_52 = arith.constant 1.000000e+00 : f32
    %155 = vector.broadcast %cst_52 : f32 to vector<8x32xf32>
    %156 = arith.subf %154, %155 : vector<8x32xf32>
    %157 = vector.extract_strided_slice %149 {offsets = [0, 96], sizes = [8, 32], strides = [1, 1]} : vector<8x128xf32> to vector<8x32xf32>
    %158 = arith.mulf %151, %137 : vector<8x32xf32>
    %159 = arith.mulf %150, %156 : vector<8x32xf32>
    %160 = arith.addf %158, %159 : vector<8x32xf32>
    %161 = math.tanh %160 : vector<8x32xf32>
    %162 = arith.mulf %157, %161 : vector<8x32xf32>
    %163 = vector.extract_strided_slice %141 {offsets = [0, 128], sizes = [8, 128], strides = [1, 1]} : vector<8x256xf32> to vector<8x128xf32>
    %164 = arith.addf %163, %5 : vector<8x128xf32>
    %165 = arith.negf %164 : vector<8x128xf32>
    %166 = math.exp %165 : vector<8x128xf32>
    %cst_53 = arith.constant 1.000000e+00 : f32
    %167 = vector.broadcast %cst_53 : f32 to vector<8x128xf32>
    %168 = arith.addf %167, %166 : vector<8x128xf32>
    %169 = arith.divf %167, %168 : vector<8x128xf32>
    %170 = vector.extract_strided_slice %169 {offsets = [0, 0], sizes = [8, 32], strides = [1, 1]} : vector<8x128xf32> to vector<8x32xf32>
    %171 = vector.extract_strided_slice %169 {offsets = [0, 32], sizes = [8, 32], strides = [1, 1]} : vector<8x128xf32> to vector<8x32xf32>
    %172 = vector.extract_strided_slice %169 {offsets = [0, 64], sizes = [8, 32], strides = [1, 1]} : vector<8x128xf32> to vector<8x32xf32>
    %cst_54 = arith.constant 2.000000e+00 : f32
    %173 = vector.broadcast %cst_54 : f32 to vector<8x32xf32>
    %174 = arith.mulf %173, %172 : vector<8x32xf32>
    %cst_55 = arith.constant 1.000000e+00 : f32
    %175 = vector.broadcast %cst_55 : f32 to vector<8x32xf32>
    %176 = arith.subf %174, %175 : vector<8x32xf32>
    %177 = vector.extract_strided_slice %169 {offsets = [0, 96], sizes = [8, 32], strides = [1, 1]} : vector<8x128xf32> to vector<8x32xf32>
    %178 = arith.mulf %171, %116 : vector<8x32xf32>
    %179 = arith.mulf %170, %176 : vector<8x32xf32>
    %180 = arith.addf %178, %179 : vector<8x32xf32>
    %181 = math.tanh %180 : vector<8x32xf32>
    %182 = arith.mulf %177, %181 : vector<8x32xf32>
    %183 = tpu.concatenate %162, %182 in 1 : vector<8x32xf32>, vector<8x32xf32> -> vector<8x64xf32>
    %cst_56 = arith.constant dense<0.000000e+00> : vector<8x256xf32>
    %184 = tpu.matmul %183, %0, %cst_56 {dimension_numbers = #tpu.dot_dimension_numbers<[1], [0], [0], [1], [0, 0, 1, 1], [], []>} : vector<8x64xf32>, vector<64x256xf32>, vector<8x256xf32> -> vector<8x256xf32>
    %185 = vector.extract_strided_slice %184 {offsets = [0, 0], sizes = [8, 128], strides = [1, 1]} : vector<8x256xf32> to vector<8x128xf32>
    %c16_57 = arith.constant 16 : index
    %c0_58 = arith.constant 0 : index
    %186 = vector.load %arg6[%c16_57, %c0_58] : memref<64x128xf32, #tpu.memory_space<vmem>>, vector<8x128xf32>
    %187 = arith.addf %185, %186 : vector<8x128xf32>
    %188 = arith.negf %187 : vector<8x128xf32>
    %189 = math.exp %188 : vector<8x128xf32>
    %cst_59 = arith.constant 1.000000e+00 : f32
    %190 = vector.broadcast %cst_59 : f32 to vector<8x128xf32>
    %191 = arith.addf %190, %189 : vector<8x128xf32>
    %192 = arith.divf %190, %191 : vector<8x128xf32>
    %193 = vector.extract_strided_slice %192 {offsets = [0, 0], sizes = [8, 32], strides = [1, 1]} : vector<8x128xf32> to vector<8x32xf32>
    %194 = vector.extract_strided_slice %192 {offsets = [0, 32], sizes = [8, 32], strides = [1, 1]} : vector<8x128xf32> to vector<8x32xf32>
    %195 = vector.extract_strided_slice %192 {offsets = [0, 64], sizes = [8, 32], strides = [1, 1]} : vector<8x128xf32> to vector<8x32xf32>
    %cst_60 = arith.constant 2.000000e+00 : f32
    %196 = vector.broadcast %cst_60 : f32 to vector<8x32xf32>
    %197 = arith.mulf %196, %195 : vector<8x32xf32>
    %cst_61 = arith.constant 1.000000e+00 : f32
    %198 = vector.broadcast %cst_61 : f32 to vector<8x32xf32>
    %199 = arith.subf %197, %198 : vector<8x32xf32>
    %200 = vector.extract_strided_slice %192 {offsets = [0, 96], sizes = [8, 32], strides = [1, 1]} : vector<8x128xf32> to vector<8x32xf32>
    %201 = arith.mulf %194, %160 : vector<8x32xf32>
    %202 = arith.mulf %193, %199 : vector<8x32xf32>
    %203 = arith.addf %201, %202 : vector<8x32xf32>
    %204 = math.tanh %203 : vector<8x32xf32>
    %205 = arith.mulf %200, %204 : vector<8x32xf32>
    %206 = vector.extract_strided_slice %184 {offsets = [0, 128], sizes = [8, 128], strides = [1, 1]} : vector<8x256xf32> to vector<8x128xf32>
    %207 = arith.addf %206, %5 : vector<8x128xf32>
    %208 = arith.negf %207 : vector<8x128xf32>
    %209 = math.exp %208 : vector<8x128xf32>
    %cst_62 = arith.constant 1.000000e+00 : f32
    %210 = vector.broadcast %cst_62 : f32 to vector<8x128xf32>
    %211 = arith.addf %210, %209 : vector<8x128xf32>
    %212 = arith.divf %210, %211 : vector<8x128xf32>
    %213 = vector.extract_strided_slice %212 {offsets = [0, 0], sizes = [8, 32], strides = [1, 1]} : vector<8x128xf32> to vector<8x32xf32>
    %214 = vector.extract_strided_slice %212 {offsets = [0, 32], sizes = [8, 32], strides = [1, 1]} : vector<8x128xf32> to vector<8x32xf32>
    %215 = vector.extract_strided_slice %212 {offsets = [0, 64], sizes = [8, 32], strides = [1, 1]} : vector<8x128xf32> to vector<8x32xf32>
    %cst_63 = arith.constant 2.000000e+00 : f32
    %216 = vector.broadcast %cst_63 : f32 to vector<8x32xf32>
    %217 = arith.mulf %216, %215 : vector<8x32xf32>
    %cst_64 = arith.constant 1.000000e+00 : f32
    %218 = vector.broadcast %cst_64 : f32 to vector<8x32xf32>
    %219 = arith.subf %217, %218 : vector<8x32xf32>
    %220 = vector.extract_strided_slice %212 {offsets = [0, 96], sizes = [8, 32], strides = [1, 1]} : vector<8x128xf32> to vector<8x32xf32>
    %221 = arith.mulf %214, %180 : vector<8x32xf32>
    %222 = arith.mulf %213, %219 : vector<8x32xf32>
    %223 = arith.addf %221, %222 : vector<8x32xf32>
    %224 = math.tanh %223 : vector<8x32xf32>
    %225 = arith.mulf %220, %224 : vector<8x32xf32>
    %226 = tpu.concatenate %205, %225 in 1 : vector<8x32xf32>, vector<8x32xf32> -> vector<8x64xf32>
    %cst_65 = arith.constant dense<0.000000e+00> : vector<8x256xf32>
    %227 = tpu.matmul %226, %0, %cst_65 {dimension_numbers = #tpu.dot_dimension_numbers<[1], [0], [0], [1], [0, 0, 1, 1], [], []>} : vector<8x64xf32>, vector<64x256xf32>, vector<8x256xf32> -> vector<8x256xf32>
    %228 = vector.extract_strided_slice %227 {offsets = [0, 0], sizes = [8, 128], strides = [1, 1]} : vector<8x256xf32> to vector<8x128xf32>
    %c24_66 = arith.constant 24 : index
    %c0_67 = arith.constant 0 : index
    %229 = vector.load %arg6[%c24_66, %c0_67] : memref<64x128xf32, #tpu.memory_space<vmem>>, vector<8x128xf32>
    %230 = arith.addf %228, %229 : vector<8x128xf32>
    %231 = arith.negf %230 : vector<8x128xf32>
    %232 = math.exp %231 : vector<8x128xf32>
    %cst_68 = arith.constant 1.000000e+00 : f32
    %233 = vector.broadcast %cst_68 : f32 to vector<8x128xf32>
    %234 = arith.addf %233, %232 : vector<8x128xf32>
    %235 = arith.divf %233, %234 : vector<8x128xf32>
    %236 = vector.extract_strided_slice %235 {offsets = [0, 0], sizes = [8, 32], strides = [1, 1]} : vector<8x128xf32> to vector<8x32xf32>
    %237 = vector.extract_strided_slice %235 {offsets = [0, 32], sizes = [8, 32], strides = [1, 1]} : vector<8x128xf32> to vector<8x32xf32>
    %238 = vector.extract_strided_slice %235 {offsets = [0, 64], sizes = [8, 32], strides = [1, 1]} : vector<8x128xf32> to vector<8x32xf32>
    %cst_69 = arith.constant 2.000000e+00 : f32
    %239 = vector.broadcast %cst_69 : f32 to vector<8x32xf32>
    %240 = arith.mulf %239, %238 : vector<8x32xf32>
    %cst_70 = arith.constant 1.000000e+00 : f32
    %241 = vector.broadcast %cst_70 : f32 to vector<8x32xf32>
    %242 = arith.subf %240, %241 : vector<8x32xf32>
    %243 = vector.extract_strided_slice %235 {offsets = [0, 96], sizes = [8, 32], strides = [1, 1]} : vector<8x128xf32> to vector<8x32xf32>
    %244 = arith.mulf %237, %203 : vector<8x32xf32>
    %245 = arith.mulf %236, %242 : vector<8x32xf32>
    %246 = arith.addf %244, %245 : vector<8x32xf32>
    %247 = math.tanh %246 : vector<8x32xf32>
    %248 = arith.mulf %243, %247 : vector<8x32xf32>
    %249 = vector.extract_strided_slice %227 {offsets = [0, 128], sizes = [8, 128], strides = [1, 1]} : vector<8x256xf32> to vector<8x128xf32>
    %250 = arith.addf %249, %5 : vector<8x128xf32>
    %251 = arith.negf %250 : vector<8x128xf32>
    %252 = math.exp %251 : vector<8x128xf32>
    %cst_71 = arith.constant 1.000000e+00 : f32
    %253 = vector.broadcast %cst_71 : f32 to vector<8x128xf32>
    %254 = arith.addf %253, %252 : vector<8x128xf32>
    %255 = arith.divf %253, %254 : vector<8x128xf32>
    %256 = vector.extract_strided_slice %255 {offsets = [0, 0], sizes = [8, 32], strides = [1, 1]} : vector<8x128xf32> to vector<8x32xf32>
    %257 = vector.extract_strided_slice %255 {offsets = [0, 32], sizes = [8, 32], strides = [1, 1]} : vector<8x128xf32> to vector<8x32xf32>
    %258 = vector.extract_strided_slice %255 {offsets = [0, 64], sizes = [8, 32], strides = [1, 1]} : vector<8x128xf32> to vector<8x32xf32>
    %cst_72 = arith.constant 2.000000e+00 : f32
    %259 = vector.broadcast %cst_72 : f32 to vector<8x32xf32>
    %260 = arith.mulf %259, %258 : vector<8x32xf32>
    %cst_73 = arith.constant 1.000000e+00 : f32
    %261 = vector.broadcast %cst_73 : f32 to vector<8x32xf32>
    %262 = arith.subf %260, %261 : vector<8x32xf32>
    %263 = vector.extract_strided_slice %255 {offsets = [0, 96], sizes = [8, 32], strides = [1, 1]} : vector<8x128xf32> to vector<8x32xf32>
    %264 = arith.mulf %257, %223 : vector<8x32xf32>
    %265 = arith.mulf %256, %262 : vector<8x32xf32>
    %266 = arith.addf %264, %265 : vector<8x32xf32>
    %267 = math.tanh %266 : vector<8x32xf32>
    %268 = arith.mulf %263, %267 : vector<8x32xf32>
    %269 = tpu.concatenate %248, %268 in 1 : vector<8x32xf32>, vector<8x32xf32> -> vector<8x64xf32>
    %cst_74 = arith.constant dense<0.000000e+00> : vector<8x256xf32>
    %270 = tpu.matmul %269, %0, %cst_74 {dimension_numbers = #tpu.dot_dimension_numbers<[1], [0], [0], [1], [0, 0, 1, 1], [], []>} : vector<8x64xf32>, vector<64x256xf32>, vector<8x256xf32> -> vector<8x256xf32>
    %271 = vector.extract_strided_slice %270 {offsets = [0, 0], sizes = [8, 128], strides = [1, 1]} : vector<8x256xf32> to vector<8x128xf32>
    %c32_75 = arith.constant 32 : index
    %c0_76 = arith.constant 0 : index
    %272 = vector.load %arg6[%c32_75, %c0_76] : memref<64x128xf32, #tpu.memory_space<vmem>>, vector<8x128xf32>
    %273 = arith.addf %271, %272 : vector<8x128xf32>
    %274 = arith.negf %273 : vector<8x128xf32>
    %275 = math.exp %274 : vector<8x128xf32>
    %cst_77 = arith.constant 1.000000e+00 : f32
    %276 = vector.broadcast %cst_77 : f32 to vector<8x128xf32>
    %277 = arith.addf %276, %275 : vector<8x128xf32>
    %278 = arith.divf %276, %277 : vector<8x128xf32>
    %279 = vector.extract_strided_slice %278 {offsets = [0, 0], sizes = [8, 32], strides = [1, 1]} : vector<8x128xf32> to vector<8x32xf32>
    %280 = vector.extract_strided_slice %278 {offsets = [0, 32], sizes = [8, 32], strides = [1, 1]} : vector<8x128xf32> to vector<8x32xf32>
    %281 = vector.extract_strided_slice %278 {offsets = [0, 64], sizes = [8, 32], strides = [1, 1]} : vector<8x128xf32> to vector<8x32xf32>
    %cst_78 = arith.constant 2.000000e+00 : f32
    %282 = vector.broadcast %cst_78 : f32 to vector<8x32xf32>
    %283 = arith.mulf %282, %281 : vector<8x32xf32>
    %cst_79 = arith.constant 1.000000e+00 : f32
    %284 = vector.broadcast %cst_79 : f32 to vector<8x32xf32>
    %285 = arith.subf %283, %284 : vector<8x32xf32>
    %286 = vector.extract_strided_slice %278 {offsets = [0, 96], sizes = [8, 32], strides = [1, 1]} : vector<8x128xf32> to vector<8x32xf32>
    %287 = arith.mulf %280, %246 : vector<8x32xf32>
    %288 = arith.mulf %279, %285 : vector<8x32xf32>
    %289 = arith.addf %287, %288 : vector<8x32xf32>
    %290 = math.tanh %289 : vector<8x32xf32>
    %291 = arith.mulf %286, %290 : vector<8x32xf32>
    %292 = vector.extract_strided_slice %270 {offsets = [0, 128], sizes = [8, 128], strides = [1, 1]} : vector<8x256xf32> to vector<8x128xf32>
    %293 = arith.addf %292, %5 : vector<8x128xf32>
    %294 = arith.negf %293 : vector<8x128xf32>
    %295 = math.exp %294 : vector<8x128xf32>
    %cst_80 = arith.constant 1.000000e+00 : f32
    %296 = vector.broadcast %cst_80 : f32 to vector<8x128xf32>
    %297 = arith.addf %296, %295 : vector<8x128xf32>
    %298 = arith.divf %296, %297 : vector<8x128xf32>
    %299 = vector.extract_strided_slice %298 {offsets = [0, 0], sizes = [8, 32], strides = [1, 1]} : vector<8x128xf32> to vector<8x32xf32>
    %300 = vector.extract_strided_slice %298 {offsets = [0, 32], sizes = [8, 32], strides = [1, 1]} : vector<8x128xf32> to vector<8x32xf32>
    %301 = vector.extract_strided_slice %298 {offsets = [0, 64], sizes = [8, 32], strides = [1, 1]} : vector<8x128xf32> to vector<8x32xf32>
    %cst_81 = arith.constant 2.000000e+00 : f32
    %302 = vector.broadcast %cst_81 : f32 to vector<8x32xf32>
    %303 = arith.mulf %302, %301 : vector<8x32xf32>
    %cst_82 = arith.constant 1.000000e+00 : f32
    %304 = vector.broadcast %cst_82 : f32 to vector<8x32xf32>
    %305 = arith.subf %303, %304 : vector<8x32xf32>
    %306 = vector.extract_strided_slice %298 {offsets = [0, 96], sizes = [8, 32], strides = [1, 1]} : vector<8x128xf32> to vector<8x32xf32>
    %307 = arith.mulf %300, %266 : vector<8x32xf32>
    %308 = arith.mulf %299, %305 : vector<8x32xf32>
    %309 = arith.addf %307, %308 : vector<8x32xf32>
    %310 = math.tanh %309 : vector<8x32xf32>
    %311 = arith.mulf %306, %310 : vector<8x32xf32>
    %312 = tpu.concatenate %291, %311 in 1 : vector<8x32xf32>, vector<8x32xf32> -> vector<8x64xf32>
    %cst_83 = arith.constant dense<0.000000e+00> : vector<8x256xf32>
    %313 = tpu.matmul %312, %0, %cst_83 {dimension_numbers = #tpu.dot_dimension_numbers<[1], [0], [0], [1], [0, 0, 1, 1], [], []>} : vector<8x64xf32>, vector<64x256xf32>, vector<8x256xf32> -> vector<8x256xf32>
    %314 = vector.extract_strided_slice %313 {offsets = [0, 0], sizes = [8, 128], strides = [1, 1]} : vector<8x256xf32> to vector<8x128xf32>
    %c40_84 = arith.constant 40 : index
    %c0_85 = arith.constant 0 : index
    %315 = vector.load %arg6[%c40_84, %c0_85] : memref<64x128xf32, #tpu.memory_space<vmem>>, vector<8x128xf32>
    %316 = arith.addf %314, %315 : vector<8x128xf32>
    %317 = arith.negf %316 : vector<8x128xf32>
    %318 = math.exp %317 : vector<8x128xf32>
    %cst_86 = arith.constant 1.000000e+00 : f32
    %319 = vector.broadcast %cst_86 : f32 to vector<8x128xf32>
    %320 = arith.addf %319, %318 : vector<8x128xf32>
    %321 = arith.divf %319, %320 : vector<8x128xf32>
    %322 = vector.extract_strided_slice %321 {offsets = [0, 0], sizes = [8, 32], strides = [1, 1]} : vector<8x128xf32> to vector<8x32xf32>
    %323 = vector.extract_strided_slice %321 {offsets = [0, 32], sizes = [8, 32], strides = [1, 1]} : vector<8x128xf32> to vector<8x32xf32>
    %324 = vector.extract_strided_slice %321 {offsets = [0, 64], sizes = [8, 32], strides = [1, 1]} : vector<8x128xf32> to vector<8x32xf32>
    %cst_87 = arith.constant 2.000000e+00 : f32
    %325 = vector.broadcast %cst_87 : f32 to vector<8x32xf32>
    %326 = arith.mulf %325, %324 : vector<8x32xf32>
    %cst_88 = arith.constant 1.000000e+00 : f32
    %327 = vector.broadcast %cst_88 : f32 to vector<8x32xf32>
    %328 = arith.subf %326, %327 : vector<8x32xf32>
    %329 = vector.extract_strided_slice %321 {offsets = [0, 96], sizes = [8, 32], strides = [1, 1]} : vector<8x128xf32> to vector<8x32xf32>
    %330 = arith.mulf %323, %289 : vector<8x32xf32>
    %331 = arith.mulf %322, %328 : vector<8x32xf32>
    %332 = arith.addf %330, %331 : vector<8x32xf32>
    %333 = math.tanh %332 : vector<8x32xf32>
    %334 = arith.mulf %329, %333 : vector<8x32xf32>
    %335 = vector.extract_strided_slice %313 {offsets = [0, 128], sizes = [8, 128], strides = [1, 1]} : vector<8x256xf32> to vector<8x128xf32>
    %336 = arith.addf %335, %5 : vector<8x128xf32>
    %337 = arith.negf %336 : vector<8x128xf32>
    %338 = math.exp %337 : vector<8x128xf32>
    %cst_89 = arith.constant 1.000000e+00 : f32
    %339 = vector.broadcast %cst_89 : f32 to vector<8x128xf32>
    %340 = arith.addf %339, %338 : vector<8x128xf32>
    %341 = arith.divf %339, %340 : vector<8x128xf32>
    %342 = vector.extract_strided_slice %341 {offsets = [0, 0], sizes = [8, 32], strides = [1, 1]} : vector<8x128xf32> to vector<8x32xf32>
    %343 = vector.extract_strided_slice %341 {offsets = [0, 32], sizes = [8, 32], strides = [1, 1]} : vector<8x128xf32> to vector<8x32xf32>
    %344 = vector.extract_strided_slice %341 {offsets = [0, 64], sizes = [8, 32], strides = [1, 1]} : vector<8x128xf32> to vector<8x32xf32>
    %cst_90 = arith.constant 2.000000e+00 : f32
    %345 = vector.broadcast %cst_90 : f32 to vector<8x32xf32>
    %346 = arith.mulf %345, %344 : vector<8x32xf32>
    %cst_91 = arith.constant 1.000000e+00 : f32
    %347 = vector.broadcast %cst_91 : f32 to vector<8x32xf32>
    %348 = arith.subf %346, %347 : vector<8x32xf32>
    %349 = vector.extract_strided_slice %341 {offsets = [0, 96], sizes = [8, 32], strides = [1, 1]} : vector<8x128xf32> to vector<8x32xf32>
    %350 = arith.mulf %343, %309 : vector<8x32xf32>
    %351 = arith.mulf %342, %348 : vector<8x32xf32>
    %352 = arith.addf %350, %351 : vector<8x32xf32>
    %353 = math.tanh %352 : vector<8x32xf32>
    %354 = arith.mulf %349, %353 : vector<8x32xf32>
    %355 = tpu.concatenate %334, %354 in 1 : vector<8x32xf32>, vector<8x32xf32> -> vector<8x64xf32>
    %cst_92 = arith.constant dense<0.000000e+00> : vector<8x256xf32>
    %356 = tpu.matmul %355, %0, %cst_92 {dimension_numbers = #tpu.dot_dimension_numbers<[1], [0], [0], [1], [0, 0, 1, 1], [], []>} : vector<8x64xf32>, vector<64x256xf32>, vector<8x256xf32> -> vector<8x256xf32>
    %357 = vector.extract_strided_slice %356 {offsets = [0, 0], sizes = [8, 128], strides = [1, 1]} : vector<8x256xf32> to vector<8x128xf32>
    %c48_93 = arith.constant 48 : index
    %c0_94 = arith.constant 0 : index
    %358 = vector.load %arg6[%c48_93, %c0_94] : memref<64x128xf32, #tpu.memory_space<vmem>>, vector<8x128xf32>
    %359 = arith.addf %357, %358 : vector<8x128xf32>
    %360 = arith.negf %359 : vector<8x128xf32>
    %361 = math.exp %360 : vector<8x128xf32>
    %cst_95 = arith.constant 1.000000e+00 : f32
    %362 = vector.broadcast %cst_95 : f32 to vector<8x128xf32>
    %363 = arith.addf %362, %361 : vector<8x128xf32>
    %364 = arith.divf %362, %363 : vector<8x128xf32>
    %365 = vector.extract_strided_slice %364 {offsets = [0, 0], sizes = [8, 32], strides = [1, 1]} : vector<8x128xf32> to vector<8x32xf32>
    %366 = vector.extract_strided_slice %364 {offsets = [0, 32], sizes = [8, 32], strides = [1, 1]} : vector<8x128xf32> to vector<8x32xf32>
    %367 = vector.extract_strided_slice %364 {offsets = [0, 64], sizes = [8, 32], strides = [1, 1]} : vector<8x128xf32> to vector<8x32xf32>
    %cst_96 = arith.constant 2.000000e+00 : f32
    %368 = vector.broadcast %cst_96 : f32 to vector<8x32xf32>
    %369 = arith.mulf %368, %367 : vector<8x32xf32>
    %cst_97 = arith.constant 1.000000e+00 : f32
    %370 = vector.broadcast %cst_97 : f32 to vector<8x32xf32>
    %371 = arith.subf %369, %370 : vector<8x32xf32>
    %372 = vector.extract_strided_slice %364 {offsets = [0, 96], sizes = [8, 32], strides = [1, 1]} : vector<8x128xf32> to vector<8x32xf32>
    %373 = arith.mulf %366, %332 : vector<8x32xf32>
    %374 = arith.mulf %365, %371 : vector<8x32xf32>
    %375 = arith.addf %373, %374 : vector<8x32xf32>
    %376 = math.tanh %375 : vector<8x32xf32>
    %377 = arith.mulf %372, %376 : vector<8x32xf32>
    %378 = vector.extract_strided_slice %356 {offsets = [0, 128], sizes = [8, 128], strides = [1, 1]} : vector<8x256xf32> to vector<8x128xf32>
    %379 = arith.addf %378, %5 : vector<8x128xf32>
    %380 = arith.negf %379 : vector<8x128xf32>
    %381 = math.exp %380 : vector<8x128xf32>
    %cst_98 = arith.constant 1.000000e+00 : f32
    %382 = vector.broadcast %cst_98 : f32 to vector<8x128xf32>
    %383 = arith.addf %382, %381 : vector<8x128xf32>
    %384 = arith.divf %382, %383 : vector<8x128xf32>
    %385 = vector.extract_strided_slice %384 {offsets = [0, 0], sizes = [8, 32], strides = [1, 1]} : vector<8x128xf32> to vector<8x32xf32>
    %386 = vector.extract_strided_slice %384 {offsets = [0, 32], sizes = [8, 32], strides = [1, 1]} : vector<8x128xf32> to vector<8x32xf32>
    %387 = vector.extract_strided_slice %384 {offsets = [0, 64], sizes = [8, 32], strides = [1, 1]} : vector<8x128xf32> to vector<8x32xf32>
    %cst_99 = arith.constant 2.000000e+00 : f32
    %388 = vector.broadcast %cst_99 : f32 to vector<8x32xf32>
    %389 = arith.mulf %388, %387 : vector<8x32xf32>
    %cst_100 = arith.constant 1.000000e+00 : f32
    %390 = vector.broadcast %cst_100 : f32 to vector<8x32xf32>
    %391 = arith.subf %389, %390 : vector<8x32xf32>
    %392 = vector.extract_strided_slice %384 {offsets = [0, 96], sizes = [8, 32], strides = [1, 1]} : vector<8x128xf32> to vector<8x32xf32>
    %393 = arith.mulf %386, %352 : vector<8x32xf32>
    %394 = arith.mulf %385, %391 : vector<8x32xf32>
    %395 = arith.addf %393, %394 : vector<8x32xf32>
    %396 = math.tanh %395 : vector<8x32xf32>
    %397 = arith.mulf %392, %396 : vector<8x32xf32>
    %398 = tpu.concatenate %377, %397 in 1 : vector<8x32xf32>, vector<8x32xf32> -> vector<8x64xf32>
    %cst_101 = arith.constant dense<0.000000e+00> : vector<8x256xf32>
    %399 = tpu.matmul %398, %0, %cst_101 {dimension_numbers = #tpu.dot_dimension_numbers<[1], [0], [0], [1], [0, 0, 1, 1], [], []>} : vector<8x64xf32>, vector<64x256xf32>, vector<8x256xf32> -> vector<8x256xf32>
    %400 = vector.extract_strided_slice %399 {offsets = [0, 0], sizes = [8, 128], strides = [1, 1]} : vector<8x256xf32> to vector<8x128xf32>
    %c56_102 = arith.constant 56 : index
    %c0_103 = arith.constant 0 : index
    %401 = vector.load %arg6[%c56_102, %c0_103] : memref<64x128xf32, #tpu.memory_space<vmem>>, vector<8x128xf32>
    %402 = arith.addf %400, %401 : vector<8x128xf32>
    %403 = arith.negf %402 : vector<8x128xf32>
    %404 = math.exp %403 : vector<8x128xf32>
    %cst_104 = arith.constant 1.000000e+00 : f32
    %405 = vector.broadcast %cst_104 : f32 to vector<8x128xf32>
    %406 = arith.addf %405, %404 : vector<8x128xf32>
    %407 = arith.divf %405, %406 : vector<8x128xf32>
    %408 = vector.extract_strided_slice %407 {offsets = [0, 0], sizes = [8, 32], strides = [1, 1]} : vector<8x128xf32> to vector<8x32xf32>
    %409 = vector.extract_strided_slice %407 {offsets = [0, 32], sizes = [8, 32], strides = [1, 1]} : vector<8x128xf32> to vector<8x32xf32>
    %410 = vector.extract_strided_slice %407 {offsets = [0, 64], sizes = [8, 32], strides = [1, 1]} : vector<8x128xf32> to vector<8x32xf32>
    %cst_105 = arith.constant 2.000000e+00 : f32
    %411 = vector.broadcast %cst_105 : f32 to vector<8x32xf32>
    %412 = arith.mulf %411, %410 : vector<8x32xf32>
    %cst_106 = arith.constant 1.000000e+00 : f32
    %413 = vector.broadcast %cst_106 : f32 to vector<8x32xf32>
    %414 = arith.subf %412, %413 : vector<8x32xf32>
    %415 = vector.extract_strided_slice %407 {offsets = [0, 96], sizes = [8, 32], strides = [1, 1]} : vector<8x128xf32> to vector<8x32xf32>
    %416 = arith.mulf %409, %375 : vector<8x32xf32>
    %417 = arith.mulf %408, %414 : vector<8x32xf32>
    %418 = arith.addf %416, %417 : vector<8x32xf32>
    %419 = math.tanh %418 : vector<8x32xf32>
    %420 = arith.mulf %415, %419 : vector<8x32xf32>
    %421 = vector.extract_strided_slice %399 {offsets = [0, 128], sizes = [8, 128], strides = [1, 1]} : vector<8x256xf32> to vector<8x128xf32>
    %422 = arith.addf %421, %5 : vector<8x128xf32>
    %423 = arith.negf %422 : vector<8x128xf32>
    %424 = math.exp %423 : vector<8x128xf32>
    %cst_107 = arith.constant 1.000000e+00 : f32
    %425 = vector.broadcast %cst_107 : f32 to vector<8x128xf32>
    %426 = arith.addf %425, %424 : vector<8x128xf32>
    %427 = arith.divf %425, %426 : vector<8x128xf32>
    %428 = vector.extract_strided_slice %427 {offsets = [0, 0], sizes = [8, 32], strides = [1, 1]} : vector<8x128xf32> to vector<8x32xf32>
    %429 = vector.extract_strided_slice %427 {offsets = [0, 32], sizes = [8, 32], strides = [1, 1]} : vector<8x128xf32> to vector<8x32xf32>
    %430 = vector.extract_strided_slice %427 {offsets = [0, 64], sizes = [8, 32], strides = [1, 1]} : vector<8x128xf32> to vector<8x32xf32>
    %cst_108 = arith.constant 2.000000e+00 : f32
    %431 = vector.broadcast %cst_108 : f32 to vector<8x32xf32>
    %432 = arith.mulf %431, %430 : vector<8x32xf32>
    %cst_109 = arith.constant 1.000000e+00 : f32
    %433 = vector.broadcast %cst_109 : f32 to vector<8x32xf32>
    %434 = arith.subf %432, %433 : vector<8x32xf32>
    %435 = vector.extract_strided_slice %427 {offsets = [0, 96], sizes = [8, 32], strides = [1, 1]} : vector<8x128xf32> to vector<8x32xf32>
    %436 = arith.mulf %429, %395 : vector<8x32xf32>
    %437 = arith.mulf %428, %434 : vector<8x32xf32>
    %438 = arith.addf %436, %437 : vector<8x32xf32>
    %439 = math.tanh %438 : vector<8x32xf32>
    %440 = arith.mulf %435, %439 : vector<8x32xf32>
    %441 = tpu.concatenate %420, %440 in 1 : vector<8x32xf32>, vector<8x32xf32> -> vector<8x64xf32>
    %cst_110 = arith.constant dense<0.000000e+00> : vector<8x256xf32>
    %442 = tpu.matmul %441, %0, %cst_110 {dimension_numbers = #tpu.dot_dimension_numbers<[1], [0], [0], [1], [0, 0, 1, 1], [], []>} : vector<8x64xf32>, vector<64x256xf32>, vector<8x256xf32> -> vector<8x256xf32>
    %443 = vector.extract_strided_slice %442 {offsets = [0, 128], sizes = [8, 128], strides = [1, 1]} : vector<8x256xf32> to vector<8x128xf32>
    %444 = arith.addf %443, %5 : vector<8x128xf32>
    %445 = arith.negf %444 : vector<8x128xf32>
    %446 = math.exp %445 : vector<8x128xf32>
    %cst_111 = arith.constant 1.000000e+00 : f32
    %447 = vector.broadcast %cst_111 : f32 to vector<8x128xf32>
    %448 = arith.addf %447, %446 : vector<8x128xf32>
    %449 = arith.divf %447, %448 : vector<8x128xf32>
    %450 = vector.extract_strided_slice %449 {offsets = [0, 0], sizes = [8, 32], strides = [1, 1]} : vector<8x128xf32> to vector<8x32xf32>
    %451 = vector.extract_strided_slice %449 {offsets = [0, 32], sizes = [8, 32], strides = [1, 1]} : vector<8x128xf32> to vector<8x32xf32>
    %452 = vector.extract_strided_slice %449 {offsets = [0, 64], sizes = [8, 32], strides = [1, 1]} : vector<8x128xf32> to vector<8x32xf32>
    %cst_112 = arith.constant 2.000000e+00 : f32
    %453 = vector.broadcast %cst_112 : f32 to vector<8x32xf32>
    %454 = arith.mulf %453, %452 : vector<8x32xf32>
    %cst_113 = arith.constant 1.000000e+00 : f32
    %455 = vector.broadcast %cst_113 : f32 to vector<8x32xf32>
    %456 = arith.subf %454, %455 : vector<8x32xf32>
    %457 = vector.extract_strided_slice %449 {offsets = [0, 96], sizes = [8, 32], strides = [1, 1]} : vector<8x128xf32> to vector<8x32xf32>
    %458 = arith.mulf %451, %438 : vector<8x32xf32>
    %459 = arith.mulf %450, %456 : vector<8x32xf32>
    %460 = arith.addf %458, %459 : vector<8x32xf32>
    %461 = math.tanh %460 : vector<8x32xf32>
    %462 = arith.mulf %457, %461 : vector<8x32xf32>
    %cst_114 = arith.constant dense<0.000000e+00> : vector<8x128xf32>
    %463 = tpu.matmul %462, %2, %cst_114 {dimension_numbers = #tpu.dot_dimension_numbers<[1], [0], [0], [1], [0, 0, 1, 1], [], []>} : vector<8x32xf32>, vector<32x128xf32>, vector<8x128xf32> -> vector<8x128xf32>
    %464 = vector.broadcast %6 : vector<1x128xf32> to vector<8x128xf32>
    %465 = arith.addf %463, %464 : vector<8x128xf32>
    %c0_115 = arith.constant 0 : index
    %c0_116 = arith.constant 0 : index
    %466 = vector.load %arg3[%c0_115, %c0_116] : memref<8x128xf32, #tpu.memory_space<vmem>>, vector<8x128xf32>
    tpu.vector_store %arg3[%c0_115, %c0_116], %465 {strides = array<i32>} : memref<8x128xf32, #tpu.memory_space<vmem>>, vector<8x128xf32>,
    %467 = tpu.iota {dimensions = array<i32: 0>} : vector<8x1xi32>
    %c2_i32 = arith.constant 2 : i32
    %468 = vector.broadcast %c2_i32 : i32 to vector<8x1xi32>
    %469 = arith.cmpi slt, %467, %468 : vector<8x1xi32>
    %470 = arith.extui %469 : vector<8x1xi1> to vector<8x1xi32>
    %471 = arith.sitofp %470 : vector<8x1xi32> to vector<8x1xf32>
    %cst_117 = arith.constant 0.000000e+00 : f32
    %472 = vector.broadcast %cst_117 : f32 to vector<8x64xf32>
    %473 = tpu.concatenate %420, %418, %472 in 1 : vector<8x32xf32>, vector<8x32xf32>, vector<8x64xf32> -> vector<8x128xf32>
    %474 = vector.broadcast %471 : vector<8x1xf32> to vector<8x128xf32>
    %475 = arith.mulf %473, %474 : vector<8x128xf32>
    %c0_118 = arith.constant 0 : index
    %c0_119 = arith.constant 0 : index
    %c0_120 = arith.constant 0 : index
    %476 = vector.load %arg4[%c0_118, %c0_119, %c0_120] : memref<2x8x128xf32, #tpu.memory_space<vmem>>, vector<1x8x128xf32>
    %477 = vector.shape_cast %476 : vector<1x8x128xf32> to vector<8x128xf32>
    %478 = vector.shape_cast %475 : vector<8x128xf32> to vector<1x8x128xf32>
    tpu.vector_store %arg4[%c0_118, %c0_119, %c0_120], %478 {strides = array<i32>} : memref<2x8x128xf32, #tpu.memory_space<vmem>>, vector<1x8x128xf32>,
    %479 = tpu.concatenate %462, %460, %472 in 1 : vector<8x32xf32>, vector<8x32xf32>, vector<8x64xf32> -> vector<8x128xf32>
    %480 = vector.broadcast %471 : vector<8x1xf32> to vector<8x128xf32>
    %481 = arith.mulf %479, %480 : vector<8x128xf32>
    %c1_121 = arith.constant 1 : index
    %c0_122 = arith.constant 0 : index
    %c0_123 = arith.constant 0 : index
    %482 = vector.load %arg4[%c1_121, %c0_122, %c0_123] : memref<2x8x128xf32, #tpu.memory_space<vmem>>, vector<1x8x128xf32>
    %483 = vector.shape_cast %482 : vector<1x8x128xf32> to vector<8x128xf32>
    %484 = vector.shape_cast %481 : vector<8x128xf32> to vector<1x8x128xf32>
    tpu.vector_store %arg4[%c1_121, %c0_122, %c0_123], %484 {strides = array<i32>} : memref<2x8x128xf32, #tpu.memory_space<vmem>>, vector<1x8x128xf32>,
    return
  }
}

</mosaic_0001>

<bundles_post_ra>
// kernel: rnn_model_forward.1
= control target key start
LH: loop header
LB: loop body
LE: loop exit
PB: predicated region body
PF: predicated region fallthrough
CT: control target
= control target key end

     0   :  { %10 = vsyncpa [#allocation7], 0  ;;  %s2499_s0 = inlined_call_operand.vmem [shape: s32[16], index: 0, kind: input, shape index: {}]   ;;  %s2500_s1 = inlined_call_operand.vmem [shape: f32[2,8,128], index: 1, kind: input, shape index: {}]   ;;  %s2501_s2 = inlined_call_operand.hbm [shape: f32[136,256], index: 2, kind: input, shape index: {}]   ;;  %s2502_s3 = inlined_call_operand.vmem [shape: f32[8,128], index: 3, kind: output, shape index: {0}]   ;;  %s2503_s4 = inlined_call_operand.hbm [shape: f32[2,8,128], index: 4, kind: output, shape index: {1}]  }
   0x1   :  { %11 = vsyncpa [#allocation5], 0 }
   0x2   :  { %12 = vsyncpa [#allocation6], 0  ;;  %s19_s17 = sshll.u32 %s2499_s0, 4  ;;  %s20_s17 = int_to_ptr.vmem [resolvable:$true] %s19_s17 }
   0x3   :  { %s2022_s18 = scalar_lea.vmem %s20_s17, 16  ;;  %p2027_p1 = scmp.lt.s32.totalorder %s20_s17, %s20_s17 }
   0x4   :  { %p2023_p0 = scmp.ne.s32.totalorder %s20_s17, %s2022_s18  ;;  %p2028_p2 = scmp.lt.s32.totalorder %s2022_s18, %s2022_s18 }
   0x6   :  { %p2029_p3 = por %p2028_p2, %p2027_p1 }
   0x8   :  { %p2030_p4 = pnand %p2029_p3, %p2023_p0 }
   0xa   :  { %2033 = shalt.err (!%p2030_p4)
}
   0xb   :  { %s2084_s19 = smov [#allocation4]   ;;  %s2085_s20 = smov [#allocation8]  }
   0xc   :  { %22 = dma.vmem_to_smem %s20_s17, 16, %s2084_s19, [#allocation7]  }
   0xd   :  { %s30_s21 = sshll.u32 %s2085_s20, 4  ;;  %s2034_s24 = scalar_lea.hbm %s2501_s2, 4352  ;;  %s31_s21 = int_to_ptr.vmem [resolvable:$true] %s30_s21 }
   0xe   :  { %p2035_p5 = scmp.ne.s32.totalorder %s2501_s2, %s2034_s24  ;;  %p2038_p6 = scmp.lt.u32.totalorder %s2034_s24, %s2501_s2 }
  0x10   :  { %p2040_p7 = pnand %p2038_p6, %p2035_p5 }
  0x12   :  { %2043 = shalt.err (!%p2040_p7)
}
  0x13   :  { %s2044_s28 = scalar_lea.vmem %s31_s21, 4352  ;;  %p2049_p9 = scmp.lt.s32.totalorder %s31_s21, %s31_s21 }
  0x14   :  { %p2045_p8 = scmp.ne.s32.totalorder %s31_s21, %s2044_s28  ;;  %p2050_p10 = scmp.lt.s32.totalorder %s2044_s28, %s2044_s28 }
  0x16   :  { %p2051_p11 = por %p2050_p10, %p2049_p9 }
  0x18   :  { %p2052_p12 = pnand %p2051_p11, %p2045_p8 }
  0x1a   :  { %2055 = shalt.err (!%p2052_p12)
}
  0x1b   :  { %s2086_s29 = smov 256   ;;  %s2087_s30 = smov 16  }
  0x1c   :  { %36 = dma.hbm_to_vmem [thread:$0]  %s2501_s2, 4352, %s31_s21, [#allocation5], %s2086_s29, %s2086_s29, %s2087_s30  }
  0x1d   :  { %2078 = dma.done.wait [#allocation7], 16  }
  0x1e   :  { %2079 = vsyncadd [#allocation7], 4294967280 }
  0x1f   :  { %2080 = dma.done.wait [#allocation5], 4352  }
  0x20   :  { %2081 = vsyncadd [#allocation5], 4294962944 }
  0x21   :  { %43 = sfence }
  0x22   :  { %v2139_v0 = vld [vmem:[%s2500_s1 + $0x8] sm:$0xff]  ;;  %v60_v1 = vld [vmem:[#allocation8 + $0x80] sm:$0xff]  ;;  %v61_v2 = vld [vmem:[#allocation8 + $0x90] sm:$0xff]  ;;  %vm74_vm0 = vcmask 523264   ;;  %v83_v3 = vlaneseq  ;;  %s2088_s9 = smov 32   ;;  %v2089_v8 = vmov 0.0  }
  0x23   :  { %331 = vrot.lane.b32.xlu0 %v2139_v0, %s2088_s9  ;;  %v1748_v4 = vpack.c.bf16 %v61_v2, %v60_v1  ;;  %v45_v5 = vld [vmem:[#allocation8 + $0x8] sm:$0xff]  ;;  %v47_v6 = vld [vmem:[#allocation8 + $0x18] sm:$0xff]  ;;  %v44_v7 = vld [vmem:[#allocation8] sm:$0xff]  ;;  %75 = vst.msk [vmem:[#allocation2] sm:$0xff] %vm74_vm0, %v2089_v8  ;;  %s2145_s2 = sld [smem:[#allocation4]]  ;;  %403 = vmatprep.mubr.f32.mxu1 %v2089_v8  ;;  %s2164_s10 = sld [smem:[#allocation4 + $0x1]] }
  0x24   :  { %76 = vst.msk [vmem:[#allocation2 + $0x8] sm:$0xff] %vm74_vm0, %v2089_v8  ;;  %77 = vst.msk [vmem:[#allocation2 + $0x10] sm:$0xff] %vm74_vm0, %v2089_v8  ;;  %v2162_v9 = vpack.c.bf16 %v47_v6, %v45_v5  ;;  %v46_v10 = vld [vmem:[#allocation8 + $0x10] sm:$0xff]  ;;  %v62_v11 = vld [vmem:[#allocation8 + $0xa0] sm:$0xff]  ;;  %s2168_s11 = sld [smem:[#allocation4 + $0x2]]  ;;  %v2174_v22 = vand.u32 127, %v83_v3 }
  0x25   :  { %78 = vst.msk [vmem:[#allocation2 + $0x18] sm:$0xff] %vm74_vm0, %v2089_v8  ;;  %79 = vst.msk [vmem:[#allocation2 + $0x20] sm:$0xff] %vm74_vm0, %v2089_v8  ;;  %v63_v12 = vld [vmem:[#allocation8 + $0xb0] sm:$0xff]  ;;  %1749 = vmatprep.subr.bf16.mxu0 %v1748_v4  ;;  %v2166_v13 = vpack.c.bf16 %v46_v10, %v44_v7  ;;  %v49_v15 = vld [vmem:[#allocation8 + $0x28] sm:$0xff]  ;;  %s2176_s12 = sld [smem:[#allocation4 + $0x3]]  ;;  %vm90_vm1 = vcmask 516096  }
  0x26   :  { %80 = vst.msk [vmem:[#allocation2 + $0x28] sm:$0xff] %vm74_vm0, %v2089_v8  ;;  %81 = vst.msk [vmem:[#allocation2 + $0x30] sm:$0xff] %vm74_vm0, %v2089_v8  ;;  %v1752_v14 = vpack.c.bf16 %v63_v12, %v62_v11  ;;  %v51_v16 = vld [vmem:[#allocation8 + $0x38] sm:$0xff]  ;;  %v48_v17 = vld [vmem:[#allocation8 + $0x20] sm:$0xff]  ;;  %1751 = vmatpush3.bf16.msra.mxu0 %v1748_v4  ;;  %1765 = vmatprep.subr.bf16.mxu1 %v2162_v9  ;;  %vm334_vm6 = vcmask 261120   ;;  %s1612_s15 = sld [smem:[#allocation4 + $0x4]] }
  0x27   :  { %82 = vst.msk [vmem:[#allocation2 + $0x38] sm:$0xff] %vm74_vm0, %v2089_v8  ;;  %v2171_v18 = vpack.c.bf16 %v51_v16, %v49_v15  ;;  %v50_v19 = vld [vmem:[#allocation8 + $0x30] sm:$0xff]  ;;  %v64_v20 = vld [vmem:[#allocation8 + $0xc0] sm:$0xff]  ;;  %1767 = vmatpush1.bf16.msra.mxu1 %v2166_v13  ;;  %v53_v25 = vld [vmem:[#allocation8 + $0x48] sm:$0xff]  ;;  %s1614_s16 = sld [smem:[#allocation4 + $0x5]]  ;;  %s1616_s17 = sld [smem:[#allocation4 + $0x6]] }
  0x28   :  { %v65_v21 = vld [vmem:[#allocation8 + $0xd0] sm:$0xff]  ;;  %1753 = vmatprep.subr.bf16.mxu0 %v1752_v14  ;;  %v2179_v23 = vpack.c.bf16 %v50_v19, %v48_v17  ;;  %v55_v26 = vld [vmem:[#allocation8 + $0x58] sm:$0xff]  ;;  %v52_v27 = vld [vmem:[#allocation8 + $0x40] sm:$0xff]  ;;  %s1618_s18 = sld [smem:[#allocation4 + $0x7]]  ;;  %s1620_s19 = sld [smem:[#allocation4 + $0x8]] }
  0x29   :  { %v1756_v24 = vpack.c.bf16 %v65_v21, %v64_v20  ;;  %1769 = vmatprep.subr.bf16.mxu1 %v2171_v18  ;;  %v2182_v28 = vpack.c.bf16 %v55_v26, %v53_v25  ;;  %v54_v29 = vld [vmem:[#allocation8 + $0x50] sm:$0xff]  ;;  %v66_v30 = vld [vmem:[#allocation8 + $0xe0] sm:$0xff]  ;;  %v57_v32 = vld [vmem:[#allocation8 + $0x68] sm:$0xff]  ;;  %v86_v34 = vstv %s2145_s2  ;;  %v93_v36 = vstv %s2164_s10  ;;  %s1622_s20 = sld [smem:[#allocation4 + $0x9]]  ;;  %s2252_s21 = sld [smem:[#allocation4 + $0xa]] }
  0x2a   :  { %v67_v31 = vld [vmem:[#allocation8 + $0xf0] sm:$0xff]  ;;  %v59_v33 = vld [vmem:[#allocation8 + $0x78] sm:$0xff]  ;;  %1755 = vmatpush3.bf16.msra.mxu0 %v1752_v14  ;;  %v2185_v35 = vpack.c.bf16 %v54_v29, %v52_v27  ;;  %vm87_vm2 = vcmp.eq.s32.totalorder %v2174_v22, %v86_v34  ;;  %vm94_vm3 = vcmp.eq.s32.totalorder %v2174_v22, %v93_v36  ;;  %v99_v39 = vstv %s2168_s11  ;;  %v56_v42 = vld [vmem:[#allocation8 + $0x60] sm:$0xff]  ;;  %s2254_s22 = sld [smem:[#allocation4 + $0xb]]  ;;  %s2256_s23 = sld [smem:[#allocation4 + $0xc]] }
  0x2b   :  { %1771 = vmatpush1.bf16.msra.mxu1 %v2179_v23  ;;  %1757 = vmatprep.subr.bf16.mxu0 %v1756_v24  ;;  %v1760_v37 = vpack.c.bf16 %v67_v31, %v66_v30  ;;  %v1605_v38 = vsel %vm87_vm2, 1.0, %v2089_v8  ;;  %v2194_v40 = vpack.c.bf16 %v59_v33, %v57_v32  ;;  %v1607_v41 = vsel %vm94_vm3, 1.0, %v2089_v8  ;;  %v58_v43 = vld [vmem:[#allocation8 + $0x70] sm:$0xff]  ;;  %v327_v50 = vld [vmem:[%s2500_s1] sm:$0xff]  ;;  %s2090_s1 = smov 64   ;;  %s2258_s24 = sld [smem:[#allocation4 + $0xd]] }
  0x2c   :  { %1773 = vmatprep.subr.bf16.mxu1 %v2182_v28  ;;  %91 = vst.msk [vmem:[#allocation2] sm:$0x1] %vm90_vm1, %v1605_v38  ;;  %vm100_vm4 = vcmp.eq.s32.totalorder %v2174_v22, %v99_v39  ;;  %v105_v44 = vstv %s2176_s12  ;;  %97 = vst.msk [vmem:[#allocation2 + $0x1] sm:$0x1] %vm90_vm1, %v1607_v41  ;;  %v2206_v47 = vpack.c.bf16 %v58_v43, %v56_v42  ;;  %s2260_s25 = sld [smem:[#allocation4 + $0xe]]  ;;  %s2262_s26 = sld [smem:[#allocation4 + $0xf]]  ;;  %v111_v7 = vstv %s1612_s15 }
  0x2d   :  { %v1609_v45 = vsel %vm100_vm4, 1.0, %v2089_v8  ;;  %vm106_vm5 = vcmp.eq.s32.totalorder %v2174_v22, %v105_v44  ;;  %v117_v10 = vstv %s1614_s16  ;;  %vm112_vm7 = vcmp.eq.s32.totalorder %v2174_v22, %v111_v7  ;;  %s2093_s0 = smov [#allocation9]  }
  0x2e   :  { %1759 = vmatpush3.bf16.msra.mxu0 %v1756_v24  ;;  %103 = vst.msk [vmem:[#allocation2 + $0x8] sm:$0x1] %vm90_vm1, %v1609_v45  ;;  %v1611_v46 = vsel %vm106_vm5, 1.0, %v2089_v8  ;;  %vm118_vm8 = vcmp.eq.s32.totalorder %v2174_v22, %v117_v10  ;;  %v123_v11 = vstv %s1616_s17  ;;  %v129_v12 = vstv %s1618_s18  ;;  %s1590_s27 = sshll.u32 %s2093_s0, 4  ;;  %s1591_s27 = int_to_ptr.vmem [resolvable:$true] %s1590_s27 }
  0x2f   :  { %1775 = vmatpush1.bf16.msra.mxu1 %v2185_v35  ;;  %1761 = vmatprep.subr.bf16.mxu0 %v1760_v37  ;;  %109 = vst.msk [vmem:[#allocation2 + $0x9] sm:$0x1] %vm90_vm1, %v1611_v46  ;;  %v1613_v14 = vsel %vm112_vm7, 1.0, %v2089_v8  ;;  %v1615_v15 = vsel %vm118_vm8, 1.0, %v2089_v8  ;;  %vm124_vm9 = vcmp.eq.s32.totalorder %v2174_v22, %v123_v11  ;;  %vm130_vm10 = vcmp.eq.s32.totalorder %v2174_v22, %v129_v12  ;;  %s2056_s28 = scalar_lea.vmem %s1591_s27, 256  ;;  %p2061_p0 = scmp.lt.s32.totalorder %s1591_s27, %s1591_s27 }
  0x30   :  { %1777 = vmatprep.subr.bf16.mxu1 %v2194_v40  ;;  %115 = vst.msk [vmem:[#allocation2 + $0x10] sm:$0x1] %vm90_vm1, %v1613_v14  ;;  %121 = vst.msk [vmem:[#allocation2 + $0x11] sm:$0x1] %vm90_vm1, %v1615_v15  ;;  %v1617_v16 = vsel %vm124_vm9, 1.0, %v2089_v8  ;;  %v1619_v17 = vsel %vm130_vm10, 1.0, %v2089_v8  ;;  %v135_v19 = vstv %s1620_s19  ;;  %v141_v20 = vstv %s1622_s20  ;;  %p2057_p13 = scmp.ne.s32.totalorder %s1591_s27, %s2056_s28  ;;  %p2062_p1 = scmp.lt.s32.totalorder %s2056_s28, %s2056_s28 }
  0x31   :  { %127 = vst.msk [vmem:[#allocation2 + $0x18] sm:$0x1] %vm90_vm1, %v1617_v16  ;;  %133 = vst.msk [vmem:[#allocation2 + $0x19] sm:$0x1] %vm90_vm1, %v1619_v17  ;;  %vm136_vm11 = vcmp.eq.s32.totalorder %v2174_v22, %v135_v19  ;;  %vm142_vm12 = vcmp.eq.s32.totalorder %v2174_v22, %v141_v20  ;;  %v147_v24 = vstv %s2252_s21  ;;  %v153_v25 = vstv %s2254_s22 }
  0x32   :  { %1763 = vmatpush3.bf16.msra.mxu0 %v1760_v37  ;;  %v1621_v26 = vsel %vm136_vm11, 1.0, %v2089_v8  ;;  %v1623_v27 = vsel %vm142_vm12, 1.0, %v2089_v8  ;;  %vm148_vm13 = vcmp.eq.s32.totalorder %v2174_v22, %v147_v24  ;;  %vm154_vm14 = vcmp.eq.s32.totalorder %v2174_v22, %v153_v25  ;;  %p2063_p2 = por %p2062_p1, %p2061_p0 }
  0x33   :  { %1779 = vmatpush1.bf16.msra.mxu1 %v2206_v47  ;;  %1781 = vmatprep.subr.bf16.mxu0 %v2162_v9  ;;  %v182_v48 = vld [vmem:[#allocation2] sm:$0xff]  ;;  %139 = vst.msk [vmem:[#allocation2 + $0x20] sm:$0x1] %vm90_vm1, %v1621_v26  ;;  %145 = vst.msk [vmem:[#allocation2 + $0x21] sm:$0x1] %vm90_vm1, %v1623_v27  ;;  %v1625_v29 = vsel %vm148_vm13, 1.0, %v2089_v8  ;;  %v159_v31 = vstv %s2256_s23  ;;  %v165_v32 = vstv %s2258_s24  ;;  %v171_v33 = vstv %s2260_s25 }
  0x34   :  { %1797 = vmatprep.subr.bf16.mxu1 %v2162_v9  ;;  %1725 = vmatprep.mubr.msk.f32.mxu0 %vm74_vm0, %v182_v48  ;;  %v1627_v30 = vsel %vm154_vm14, 1.0, %v2089_v8  ;;  %151 = vst.msk [vmem:[#allocation2 + $0x28] sm:$0x1] %vm90_vm1, %v1625_v29  ;;  %vm160_vm15 = vcmp.eq.s32.totalorder %v2174_v22, %v159_v31  ;;  %vm166_vm2 = vcmp.eq.s32.totalorder %v2174_v22, %v165_v32  ;;  %v177_v34 = vstv %s2262_s26  ;;  %p2064_p3 = pnand %p2063_p2, %p2057_p13 }
  0x35   :  { %157 = vst.msk [vmem:[#allocation2 + $0x29] sm:$0x1] %vm90_vm1, %v1627_v30  ;;  %v1629_v36 = vsel %vm160_vm15, 1.0, %v2089_v8  ;;  %v1631_v37 = vsel %vm166_vm2, 1.0, %v2089_v8  ;;  %vm172_vm3 = vcmp.eq.s32.totalorder %v2174_v22, %v171_v33  ;;  %vm178_vm4 = vcmp.eq.s32.totalorder %v2174_v22, %v177_v34 }
  0x36   :  { %v183_v49 = vld [vmem:[#allocation2 + $0x8] sm:$0xff]  ;;  %163 = vst.msk [vmem:[#allocation2 + $0x30] sm:$0x1] %vm90_vm1, %v1629_v36  ;;  %169 = vst.msk [vmem:[#allocation2 + $0x31] sm:$0x1] %vm90_vm1, %v1631_v37  ;;  %v1633_v38 = vsel %vm172_vm3, 1.0, %v2089_v8 }
  0x37   :  { %1726 = vmatmul.mubr.msk.f32.vlgmr.msra.gmra.mrb[0].mxu0 %vm74_vm0, %v183_v49  ;;  %v1635_v39 = vsel %vm178_vm4, 1.0, %v2089_v8  ;;  %v184_v41 = vld [vmem:[#allocation2 + $0x10] sm:$0xff]  ;;  %175 = vst.msk [vmem:[#allocation2 + $0x38] sm:$0x1] %vm90_vm1, %v1633_v38  ;;  %vm2092_vm5 = vmmov 0  }
  0x38   :  { %1783 = vmatpush1.bf16.msra.mxu0 %v2166_v13  ;;  %181 = vst.msk [vmem:[#allocation2 + $0x39] sm:$0x1] %vm90_vm1, %v1635_v39  ;;  %1728 = vmatprep.mubr.msk.f32.mxu0 %vm74_vm0, %v184_v41  ;;  %v185_v42 = vld [vmem:[#allocation2 + $0x18] sm:$0xff] }
  0x39   :  { %1785 = vmatprep.subr.bf16.mxu0 %v2171_v18 }
  0x3a   :  { %v186_v43 = vld [vmem:[#allocation2 + $0x20] sm:$0xff] }
  0x3b   :  { %1729 = vmatmul.mubr.msk.f32.gmra.mrb[2].mxu0 %vm74_vm0, %v185_v42 }
  0x3c   :  { %1787 = vmatpush1.bf16.msra.mxu0 %v2179_v23  ;;  %1731 = vmatprep.mubr.msk.f32.mxu0 %vm74_vm0, %v186_v43  ;;  %v187_v22 = vld [vmem:[#allocation2 + $0x28] sm:$0xff] }
  0x3d   :  { %1789 = vmatprep.subr.bf16.mxu0 %v2182_v28  ;;  %v188_v44 = vld [vmem:[#allocation2 + $0x30] sm:$0xff] }
  0x3f   :  { %1732 = vmatmul.mubr.msk.f32.gmra.mrb[4].mxu0 %vm74_vm0, %v187_v22  ;;  %v189_v45 = vld [vmem:[#allocation2 + $0x38] sm:$0xff] }
  0x40   :  { %1791 = vmatpush1.bf16.msra.mxu0 %v2185_v35  ;;  %1734 = vmatprep.mubr.msk.f32.mxu0 %vm74_vm0, %v188_v44 }
  0x41   :  { %1793 = vmatprep.subr.bf16.mxu0 %v2194_v40 }
  0x43   :  { %1735 = vmatmul.mubr.msk.f32.gmra.mrb[6].mxu0 %vm74_vm0, %v189_v45 }
  0x44   :  { %1795 = vmatpush1.bf16.msra.mxu0 %v2206_v47  ;;  %508 = vmatprep.mubr.f32.mxu0 %v2089_v8 }
  0x45   :  { %1813 = vmatprep.subr.bf16.mxu0 %v2162_v9 }
  0x95   :  { %v2226_v51 = vpop.permute.xlu0 %331 }
  0x96   :  { %v335_v52 = vsel %vm334_vm6, %v327_v50, %v2226_v51 }
  0x97   :  { %1645 = vmatmul.mubr.msk.f32.vlgmr.msra.gmra.mrb[0].mxu1 %vm74_vm0, %v335_v52 }
  0x98   :  { %1799 = vmatpush1.bf16.msra.mxu1 %v2166_v13  ;;  %644 = vmatprep.mubr.f32.mxu1 %v2089_v8 }
  0x99   :  { %1801 = vmatprep.subr.bf16.mxu1 %v2171_v18 }
  0x9c   :  { %1803 = vmatpush1.bf16.msra.mxu1 %v2179_v23 }
  0x9d   :  { %1805 = vmatprep.subr.bf16.mxu1 %v2182_v28 }
  0xa0   :  { %1807 = vmatpush1.bf16.msra.mxu1 %v2185_v35 }
  0xa1   :  { %1809 = vmatprep.subr.bf16.mxu1 %v2194_v40 }
  0xa4   :  { %1811 = vmatpush1.bf16.msra.mxu1 %v2206_v47 }
  0xa5   :  { %1829 = vmatprep.subr.bf16.mxu1 %v2162_v9 }
 0x10a   :  { %v2240_v53 = vpop.f32.mrb[0].mxu0 }
 0x10b   :  { %v280_v54 = vpop.f32.mrb[1].mxu0 }
 0x10e   :  { %v2316_v49 = vpop.f32.mrb[2].mxu0 }
 0x16a   :  { %v405_v55 = vpop.f32.mrb[0].mxu1 }
 0x16b   :  { %v410_v56 = vadd.f32 %v405_v55, %v280_v54  ;;  %v407_v57 = vpop.f32.mrb[1].mxu1 }
 0x16d   :  { %v1646_v58 = vmul.f32 -1.442695, %v410_v56 }
 0x16f   :  { %1926 = vpow2.f32 %v1646_v58 }
 0x179   :  { %v1927_v59 = vpop.eup %1926 }
 0x17a   :  { %v414_v60 = vadd.f32 1.0, %v1927_v59 }
 0x17c   :  { %1928 = vrcp.f32 %v414_v60 }
 0x186   :  { %v2242_v61 = vpop.eup %1928 }
 0x187   :  { %v417_v62 = vmul.f32 2.0, %v2242_v61  ;;  %v419_v4 = vmul.f32 %v2242_v61, %v327_v50  ;;  %v2318_v50 = vpop.f32.mrb[3].mxu0 }
 0x188   :  { %v2320_v52 = vpop.f32.mrb[4].mxu0 }
 0x189   :  { %v1647_v63 = vadd.f32 -1.0, %v417_v62  ;;  %v2322_v54 = vpop.f32.mrb[5].mxu0 }
 0x18a   :  { %v2324_v55 = vpop.f32.mrb[6].mxu0 }
 0x18b   :  { %421 = vrot.lane.b32.xlu0 %v1647_v63, %s2090_s1  ;;  %v2326_v56 = vpop.f32.mrb[7].mxu0 }
 0x1fd   :  { %v422_v1 = vpop.permute.xlu0 %421 }
 0x1fe   :  { %v424_v2 = vmul.f32 %v2242_v61, %v422_v1 }
 0x200   :  { %426 = vrot.lane.b32.xlu1 %v424_v2, %s2088_s9 }
 0x272   :  { %v427_v5 = vpop.permute.xlu1 %426 }
 0x273   :  { %v2249_v6 = vadd.f32 %v427_v5, %v419_v4 }
 0x275   :  { %1930 = vtanh.f32 %v2249_v6 }
 0x27f   :  { %v1931_v21 = vpop.eup %1930 }
 0x280   :  { %432 = vrot.lane.b32.xlu1 %v1931_v21, %s2090_s1 }
 0x2f2   :  { %v433_v46 = vpop.permute.xlu1 %432 }
 0x2f3   :  { %v435_v48 = vmul.f32 %v2242_v61, %v433_v46 }
 0x2f5   :  { %437 = vrot.lane.b32.xlu0 %v435_v48, %s2088_s9 }
 0x367   :  { %v438_v57 = vpop.permute.xlu0 %437 }
 0x368   :  { %v440_v58 = vsel %vm334_vm6, %v438_v57, %v2226_v51  ;;  %v2340_v51 = vld [vmem:[#allocation8 + $0x100] ss:$0 sm:$0xff] }
 0x369   :  { %1648 = vmatmul.mubr.msk.f32.vlgmr.msra.gmra.mrb[8].mxu0 %vm74_vm0, %v440_v58 }
 0x36a   :  { %1815 = vmatpush1.bf16.msra.mxu0 %v2166_v13  ;;  %780 = vmatprep.mubr.f32.mxu0 %v2089_v8 }
 0x36b   :  { %1817 = vmatprep.subr.bf16.mxu0 %v2171_v18 }
 0x36e   :  { %1819 = vmatpush1.bf16.msra.mxu0 %v2179_v23 }
 0x36f   :  { %1821 = vmatprep.subr.bf16.mxu0 %v2182_v28 }
 0x372   :  { %1823 = vmatpush1.bf16.msra.mxu0 %v2185_v35 }
 0x373   :  { %1825 = vmatprep.subr.bf16.mxu0 %v2194_v40 }
 0x376   :  { %1827 = vmatpush1.bf16.msra.mxu0 %v2206_v47 }
 0x377   :  { %1845 = vmatprep.subr.bf16.mxu0 %v2162_v9 }
 0x43c   :  { %v510_v59 = vpop.f32.mrb[8].mxu0 }
 0x43d   :  { %v516_v60 = vadd.f32 %v2240_v53, %v510_v59  ;;  %v512_v61 = vpop.f32.mrb[9].mxu0 }
 0x43e   :  { %v542_v62 = vadd.f32 %v512_v61, %v2340_v51 }
 0x43f   :  { %v1649_v63 = vmul.f32 -1.442695, %v516_v60 }
 0x440   :  { %v1651_v1 = vmul.f32 -1.442695, %v542_v62 }
 0x441   :  { %1932 = vpow2.f32 %v1649_v63 }
 0x442   :  { %1934 = vpow2.f32 %v1651_v1 }
 0x44b   :  { %v1933_v2 = vpop.eup %1932 }
 0x44c   :  { %v1935_v4 = vpop.eup %1934  ;;  %v520_v5 = vadd.f32 1.0, %v1933_v2 }
 0x44d   :  { %v546_v7 = vadd.f32 1.0, %v1935_v4 }
 0x44e   :  { %1936 = vrcp.f32 %v520_v5 }
 0x44f   :  { %1938 = vrcp.f32 %v546_v7 }
 0x458   :  { %v1937_v10 = vpop.eup %1936 }
 0x459   :  { %v1939_v11 = vpop.eup %1938  ;;  %v523_v12 = vmul.f32 2.0, %v1937_v10  ;;  %v525_v21 = vmul.f32 %v1937_v10, %v2249_v6 }
 0x45a   :  { %v549_v14 = vmul.f32 2.0, %v1939_v11  ;;  %v551_v25 = vmul.f32 %v1939_v11, %v2139_v0 }
 0x45b   :  { %v1650_v15 = vadd.f32 -1.0, %v523_v12 }
 0x45c   :  { %v1652_v16 = vadd.f32 -1.0, %v549_v14 }
 0x45d   :  { %527 = vrot.lane.b32.xlu1 %v1650_v15, %s2090_s1 }
 0x45e   :  { %553 = vrot.lane.b32.xlu0 %v1652_v16, %s2090_s1 }
 0x4cf   :  { %v528_v53 = vpop.permute.xlu1 %527 }
 0x4d0   :  { %v530_v17 = vmul.f32 %v1937_v10, %v528_v53  ;;  %v554_v19 = vpop.permute.xlu0 %553 }
 0x4d1   :  { %v556_v20 = vmul.f32 %v1939_v11, %v554_v19 }
 0x4d2   :  { %532 = vrot.lane.b32.xlu1 %v530_v17, %s2088_s9 }
 0x4d3   :  { %558 = vrot.lane.b32.xlu0 %v556_v20, %s2088_s9 }
 0x544   :  { %v533_v24 = vpop.permute.xlu1 %532 }
 0x545   :  { %v535_v26 = vadd.f32 %v533_v24, %v525_v21  ;;  %v559_v27 = vpop.permute.xlu0 %558 }
 0x546   :  { %v561_v29 = vadd.f32 %v559_v27, %v551_v25 }
 0x547   :  { %1940 = vtanh.f32 %v535_v26 }
 0x548   :  { %1942 = vtanh.f32 %v561_v29 }
 0x551   :  { %v1941_v30 = vpop.eup %1940 }
 0x552   :  { %v1943_v31 = vpop.eup %1942  ;;  %538 = vrot.lane.b32.xlu1 %v1941_v30, %s2090_s1 }
 0x553   :  { %564 = vrot.lane.b32.xlu0 %v1943_v31, %s2090_s1 }
 0x5c4   :  { %v539_v32 = vpop.permute.xlu1 %538 }
 0x5c5   :  { %v541_v33 = vmul.f32 %v1937_v10, %v539_v32  ;;  %v565_v34 = vpop.permute.xlu0 %564 }
 0x5c6   :  { %v567_v36 = vmul.f32 %v1939_v11, %v565_v34 }
 0x5c7   :  { %569 = vrot.lane.b32.xlu1 %v541_v33, %s2088_s9 }
 0x5c8   :  { %573 = vrot.lane.b32.xlu0 %v567_v36, %s2090_s1 }
 0x639   :  { %v570_v0 = vpop.permute.xlu1 %569 }
 0x63a   :  { %v574_v6 = vpop.permute.xlu0 %573 }
 0x63b   :  { %v576_v37 = vsel %vm334_vm6, %v570_v0, %v574_v6 }
 0x63c   :  { %1653 = vmatmul.mubr.msk.f32.vlgmr.msra.gmra.mrb[2].mxu1 %vm74_vm0, %v576_v37 }
 0x63d   :  { %1831 = vmatpush1.bf16.msra.mxu1 %v2166_v13  ;;  %916 = vmatprep.mubr.f32.mxu1 %v2089_v8 }
 0x63e   :  { %1833 = vmatprep.subr.bf16.mxu1 %v2171_v18 }
 0x641   :  { %1835 = vmatpush1.bf16.msra.mxu1 %v2179_v23 }
 0x642   :  { %1837 = vmatprep.subr.bf16.mxu1 %v2182_v28 }
 0x645   :  { %1839 = vmatpush1.bf16.msra.mxu1 %v2185_v35 }
 0x646   :  { %1841 = vmatprep.subr.bf16.mxu1 %v2194_v40 }
 0x649   :  { %1843 = vmatpush1.bf16.msra.mxu1 %v2206_v47 }
 0x64a   :  { %1861 = vmatprep.subr.bf16.mxu1 %v2162_v9 }
 0x70f   :  { %v646_v38 = vpop.f32.mrb[2].mxu1 }
 0x710   :  { %v652_v39 = vadd.f32 %v646_v38, %v2318_v50  ;;  %v648_v41 = vpop.f32.mrb[3].mxu1 }
 0x711   :  { %v678_v42 = vadd.f32 %v648_v41, %v2340_v51 }
 0x712   :  { %v1654_v43 = vmul.f32 -1.442695, %v652_v39 }
 0x713   :  { %v1656_v22 = vmul.f32 -1.442695, %v678_v42 }
 0x714   :  { %1944 = vpow2.f32 %v1654_v43 }
 0x715   :  { %1946 = vpow2.f32 %v1656_v22 }
 0x71e   :  { %v1945_v44 = vpop.eup %1944 }
 0x71f   :  { %v1947_v45 = vpop.eup %1946  ;;  %v656_v46 = vadd.f32 1.0, %v1945_v44 }
 0x720   :  { %v682_v48 = vadd.f32 1.0, %v1947_v45 }
 0x721   :  { %1948 = vrcp.f32 %v656_v46 }
 0x722   :  { %1950 = vrcp.f32 %v682_v48 }
 0x72b   :  { %v1949_v57 = vpop.eup %1948 }
 0x72c   :  { %v1951_v58 = vpop.eup %1950  ;;  %v659_v59 = vmul.f32 2.0, %v1949_v57  ;;  %v661_v4 = vmul.f32 %v1949_v57, %v535_v26 }
 0x72d   :  { %v685_v60 = vmul.f32 2.0, %v1951_v58  ;;  %v687_v7 = vmul.f32 %v1951_v58, %v561_v29 }
 0x72e   :  { %v1655_v61 = vadd.f32 -1.0, %v659_v59 }
 0x72f   :  { %v1657_v62 = vadd.f32 -1.0, %v685_v60 }
 0x730   :  { %663 = vrot.lane.b32.xlu1 %v1655_v61, %s2090_s1 }
 0x731   :  { %689 = vrot.lane.b32.xlu0 %v1657_v62, %s2090_s1 }
 0x7a2   :  { %v664_v50 = vpop.permute.xlu1 %663 }
 0x7a3   :  { %v666_v63 = vmul.f32 %v1949_v57, %v664_v50  ;;  %v690_v1 = vpop.permute.xlu0 %689 }
 0x7a4   :  { %v692_v2 = vmul.f32 %v1951_v58, %v690_v1 }
 0x7a5   :  { %668 = vrot.lane.b32.xlu1 %v666_v63, %s2088_s9 }
 0x7a6   :  { %694 = vrot.lane.b32.xlu0 %v692_v2, %s2088_s9 }
 0x817   :  { %v669_v5 = vpop.permute.xlu1 %668 }
 0x818   :  { %v671_v10 = vadd.f32 %v669_v5, %v661_v4  ;;  %v695_v11 = vpop.permute.xlu0 %694 }
 0x819   :  { %v697_v12 = vadd.f32 %v695_v11, %v687_v7 }
 0x81a   :  { %1952 = vtanh.f32 %v671_v10 }
 0x81b   :  { %1954 = vtanh.f32 %v697_v12 }
 0x824   :  { %v1953_v14 = vpop.eup %1952 }
 0x825   :  { %v1955_v15 = vpop.eup %1954  ;;  %674 = vrot.lane.b32.xlu1 %v1953_v14, %s2090_s1 }
 0x826   :  { %700 = vrot.lane.b32.xlu0 %v1955_v15, %s2090_s1 }
 0x897   :  { %v675_v16 = vpop.permute.xlu1 %674 }
 0x898   :  { %v677_v53 = vmul.f32 %v1949_v57, %v675_v16  ;;  %v701_v17 = vpop.permute.xlu0 %700 }
 0x899   :  { %v703_v19 = vmul.f32 %v1951_v58, %v701_v17 }
 0x89a   :  { %705 = vrot.lane.b32.xlu1 %v677_v53, %s2088_s9 }
 0x89b   :  { %709 = vrot.lane.b32.xlu0 %v703_v19, %s2090_s1 }
 0x90c   :  { %v706_v20 = vpop.permute.xlu1 %705 }
 0x90d   :  { %v710_v21 = vpop.permute.xlu0 %709 }
 0x90e   :  { %v712_v24 = vsel %vm334_vm6, %v706_v20, %v710_v21 }
 0x90f   :  { %1658 = vmatmul.mubr.msk.f32.vlgmr.msra.gmra.mrb[10].mxu0 %vm74_vm0, %v712_v24 }
 0x910   :  { %1847 = vmatpush1.bf16.msra.mxu0 %v2166_v13  ;;  %1052 = vmatprep.mubr.f32.mxu0 %v2089_v8 }
 0x911   :  { %1849 = vmatprep.subr.bf16.mxu0 %v2171_v18 }
 0x914   :  { %1851 = vmatpush1.bf16.msra.mxu0 %v2179_v23 }
 0x915   :  { %1853 = vmatprep.subr.bf16.mxu0 %v2182_v28 }
 0x918   :  { %1855 = vmatpush1.bf16.msra.mxu0 %v2185_v35 }
 0x919   :  { %1857 = vmatprep.subr.bf16.mxu0 %v2194_v40 }
 0x91c   :  { %1859 = vmatpush1.bf16.msra.mxu0 %v2206_v47 }
 0x91d   :  { %1877 = vmatprep.subr.bf16.mxu0 %v2162_v9 }
 0x9e2   :  { %v782_v25 = vpop.f32.mrb[10].mxu0 }
 0x9e3   :  { %v788_v26 = vadd.f32 %v2316_v49, %v782_v25  ;;  %v784_v27 = vpop.f32.mrb[11].mxu0 }
 0x9e4   :  { %v814_v29 = vadd.f32 %v784_v27, %v2340_v51 }
 0x9e5   :  { %v1659_v30 = vmul.f32 -1.442695, %v788_v26 }
 0x9e6   :  { %v1661_v31 = vmul.f32 -1.442695, %v814_v29 }
 0x9e7   :  { %1956 = vpow2.f32 %v1659_v30 }
 0x9e8   :  { %1958 = vpow2.f32 %v1661_v31 }
 0x9f1   :  { %v1957_v32 = vpop.eup %1956 }
 0x9f2   :  { %v1959_v33 = vpop.eup %1958  ;;  %v792_v34 = vadd.f32 1.0, %v1957_v32 }
 0x9f3   :  { %v818_v36 = vadd.f32 1.0, %v1959_v33 }
 0x9f4   :  { %1960 = vrcp.f32 %v792_v34 }
 0x9f5   :  { %1962 = vrcp.f32 %v818_v36 }
 0x9fe   :  { %v1961_v0 = vpop.eup %1960 }
 0x9ff   :  { %v1963_v6 = vpop.eup %1962  ;;  %v795_v37 = vmul.f32 2.0, %v1961_v0  ;;  %v797_v44 = vmul.f32 %v1961_v0, %v671_v10 }
 0xa00   :  { %v821_v38 = vmul.f32 2.0, %v1963_v6  ;;  %v823_v46 = vmul.f32 %v1963_v6, %v697_v12 }
 0xa01   :  { %v1660_v39 = vadd.f32 -1.0, %v795_v37 }
 0xa02   :  { %v1662_v41 = vadd.f32 -1.0, %v821_v38 }
 0xa03   :  { %799 = vrot.lane.b32.xlu1 %v1660_v39, %s2090_s1 }
 0xa04   :  { %825 = vrot.lane.b32.xlu0 %v1662_v41, %s2090_s1 }
 0xa75   :  { %v800_v49 = vpop.permute.xlu1 %799 }
 0xa76   :  { %v802_v42 = vmul.f32 %v1961_v0, %v800_v49  ;;  %v826_v43 = vpop.permute.xlu0 %825 }
 0xa77   :  { %v828_v22 = vmul.f32 %v1963_v6, %v826_v43 }
 0xa78   :  { %804 = vrot.lane.b32.xlu1 %v802_v42, %s2088_s9 }
 0xa79   :  { %830 = vrot.lane.b32.xlu0 %v828_v22, %s2088_s9 }
 0xaea   :  { %v805_v45 = vpop.permute.xlu1 %804 }
 0xaeb   :  { %v807_v48 = vadd.f32 %v805_v45, %v797_v44  ;;  %v831_v57 = vpop.permute.xlu0 %830 }
 0xaec   :  { %v833_v58 = vadd.f32 %v831_v57, %v823_v46 }
 0xaed   :  { %1964 = vtanh.f32 %v807_v48 }
 0xaee   :  { %1966 = vtanh.f32 %v833_v58 }
 0xaf7   :  { %v1965_v59 = vpop.eup %1964 }
 0xaf8   :  { %v1967_v60 = vpop.eup %1966  ;;  %810 = vrot.lane.b32.xlu1 %v1965_v59, %s2090_s1 }
 0xaf9   :  { %836 = vrot.lane.b32.xlu0 %v1967_v60, %s2090_s1 }
 0xb6a   :  { %v811_v61 = vpop.permute.xlu1 %810 }
 0xb6b   :  { %v813_v62 = vmul.f32 %v1961_v0, %v811_v61  ;;  %v837_v50 = vpop.permute.xlu0 %836 }
 0xb6c   :  { %v839_v63 = vmul.f32 %v1963_v6, %v837_v50 }
 0xb6d   :  { %841 = vrot.lane.b32.xlu1 %v813_v62, %s2088_s9 }
 0xb6e   :  { %845 = vrot.lane.b32.xlu0 %v839_v63, %s2090_s1 }
 0xbdf   :  { %v842_v1 = vpop.permute.xlu1 %841 }
 0xbe0   :  { %v846_v2 = vpop.permute.xlu0 %845 }
 0xbe1   :  { %v848_v4 = vsel %vm334_vm6, %v842_v1, %v846_v2 }
 0xbe2   :  { %1663 = vmatmul.mubr.msk.f32.vlgmr.msra.gmra.mrb[4].mxu1 %vm74_vm0, %v848_v4 }
 0xbe3   :  { %1863 = vmatpush1.bf16.msra.mxu1 %v2166_v13  ;;  %1188 = vmatprep.mubr.f32.mxu1 %v2089_v8 }
 0xbe4   :  { %1865 = vmatprep.subr.bf16.mxu1 %v2171_v18 }
 0xbe7   :  { %1867 = vmatpush1.bf16.msra.mxu1 %v2179_v23 }
 0xbe8   :  { %1869 = vmatprep.subr.bf16.mxu1 %v2182_v28 }
 0xbeb   :  { %1871 = vmatpush1.bf16.msra.mxu1 %v2185_v35 }
 0xbec   :  { %1873 = vmatprep.subr.bf16.mxu1 %v2194_v40 }
 0xbef   :  { %1875 = vmatpush1.bf16.msra.mxu1 %v2206_v47 }
 0xbf0   :  { %1893 = vmatprep.subr.bf16.mxu1 %v2162_v9 }
 0xcb5   :  { %v918_v5 = vpop.f32.mrb[4].mxu1 }
 0xcb6   :  { %v924_v7 = vadd.f32 %v918_v5, %v2322_v54  ;;  %v920_v10 = vpop.f32.mrb[5].mxu1 }
 0xcb7   :  { %v950_v11 = vadd.f32 %v920_v10, %v2340_v51 }
 0xcb8   :  { %v1664_v12 = vmul.f32 -1.442695, %v924_v7 }
 0xcb9   :  { %v1666_v14 = vmul.f32 -1.442695, %v950_v11 }
 0xcba   :  { %1968 = vpow2.f32 %v1664_v12 }
 0xcbb   :  { %1970 = vpow2.f32 %v1666_v14 }
 0xcc4   :  { %v1969_v15 = vpop.eup %1968 }
 0xcc5   :  { %v1971_v16 = vpop.eup %1970  ;;  %v928_v53 = vadd.f32 1.0, %v1969_v15 }
 0xcc6   :  { %v954_v17 = vadd.f32 1.0, %v1971_v16 }
 0xcc7   :  { %1972 = vrcp.f32 %v928_v53 }
 0xcc8   :  { %1974 = vrcp.f32 %v954_v17 }
 0xcd1   :  { %v1973_v19 = vpop.eup %1972 }
 0xcd2   :  { %v1975_v20 = vpop.eup %1974  ;;  %v931_v21 = vmul.f32 2.0, %v1973_v19  ;;  %v933_v30 = vmul.f32 %v1973_v19, %v807_v48 }
 0xcd3   :  { %v957_v9 = vmul.f32 2.0, %v1975_v20  ;;  %v959_v32 = vmul.f32 %v1975_v20, %v833_v58 }
 0xcd4   :  { %v1665_v24 = vadd.f32 -1.0, %v931_v21 }
 0xcd5   :  { %v1667_v25 = vadd.f32 -1.0, %v957_v9 }
 0xcd6   :  { %935 = vrot.lane.b32.xlu1 %v1665_v24, %s2090_s1 }
 0xcd7   :  { %961 = vrot.lane.b32.xlu0 %v1667_v25, %s2090_s1 }
 0xd48   :  { %v936_v54 = vpop.permute.xlu1 %935 }
 0xd49   :  { %v938_v26 = vmul.f32 %v1973_v19, %v936_v54  ;;  %v962_v27 = vpop.permute.xlu0 %961 }
 0xd4a   :  { %v964_v29 = vmul.f32 %v1975_v20, %v962_v27 }
 0xd4b   :  { %940 = vrot.lane.b32.xlu1 %v938_v26, %s2088_s9 }
 0xd4c   :  { %966 = vrot.lane.b32.xlu0 %v964_v29, %s2088_s9 }
 0xdbd   :  { %v941_v31 = vpop.permute.xlu1 %940 }
 0xdbe   :  { %v943_v33 = vadd.f32 %v941_v31, %v933_v30  ;;  %v967_v34 = vpop.permute.xlu0 %966 }
 0xdbf   :  { %v969_v36 = vadd.f32 %v967_v34, %v959_v32 }
 0xdc0   :  { %1976 = vtanh.f32 %v943_v33 }
 0xdc1   :  { %1978 = vtanh.f32 %v969_v36 }
 0xdca   :  { %v1977_v0 = vpop.eup %1976 }
 0xdcb   :  { %v1979_v6 = vpop.eup %1978  ;;  %946 = vrot.lane.b32.xlu1 %v1977_v0, %s2090_s1 }
 0xdcc   :  { %972 = vrot.lane.b32.xlu0 %v1979_v6, %s2090_s1 }
 0xe3d   :  { %v947_v37 = vpop.permute.xlu1 %946 }
 0xe3e   :  { %v949_v38 = vmul.f32 %v1973_v19, %v947_v37  ;;  %v973_v39 = vpop.permute.xlu0 %972 }
 0xe3f   :  { %v975_v41 = vmul.f32 %v1975_v20, %v973_v39 }
 0xe40   :  { %977 = vrot.lane.b32.xlu1 %v949_v38, %s2088_s9 }
 0xe41   :  { %981 = vrot.lane.b32.xlu0 %v975_v41, %s2090_s1 }
 0xeb2   :  { %v978_v49 = vpop.permute.xlu1 %977 }
 0xeb3   :  { %v982_v42 = vpop.permute.xlu0 %981 }
 0xeb4   :  { %v984_v43 = vsel %vm334_vm6, %v978_v49, %v982_v42 }
 0xeb5   :  { %1668 = vmatmul.mubr.msk.f32.vlgmr.msra.gmra.mrb[12].mxu0 %vm74_vm0, %v984_v43 }
 0xeb6   :  { %1879 = vmatpush1.bf16.msra.mxu0 %v2166_v13  ;;  %1324 = vmatprep.mubr.f32.mxu0 %v2089_v8 }
 0xeb7   :  { %1881 = vmatprep.subr.bf16.mxu0 %v2171_v18 }
 0xeba   :  { %1883 = vmatpush1.bf16.msra.mxu0 %v2179_v23 }
 0xebb   :  { %1885 = vmatprep.subr.bf16.mxu0 %v2182_v28 }
 0xebe   :  { %1887 = vmatpush1.bf16.msra.mxu0 %v2185_v35 }
 0xebf   :  { %1889 = vmatprep.subr.bf16.mxu0 %v2194_v40 }
 0xec2   :  { %1891 = vmatpush1.bf16.msra.mxu0 %v2206_v47 }
 0xf88   :  { %v1054_v22 = vpop.f32.mrb[12].mxu0 }
 0xf89   :  { %v1060_v44 = vadd.f32 %v2320_v52, %v1054_v22  ;;  %v1056_v45 = vpop.f32.mrb[13].mxu0 }
 0xf8a   :  { %v1086_v46 = vadd.f32 %v1056_v45, %v2340_v51 }
 0xf8b   :  { %v1669_v48 = vmul.f32 -1.442695, %v1060_v44 }
 0xf8c   :  { %v1671_v57 = vmul.f32 -1.442695, %v1086_v46 }
 0xf8d   :  { %1980 = vpow2.f32 %v1669_v48 }
 0xf8e   :  { %1982 = vpow2.f32 %v1671_v57 }
 0xf97   :  { %v1981_v58 = vpop.eup %1980 }
 0xf98   :  { %v1983_v59 = vpop.eup %1982  ;;  %v1064_v60 = vadd.f32 1.0, %v1981_v58 }
 0xf99   :  { %v1090_v61 = vadd.f32 1.0, %v1983_v59 }
 0xf9a   :  { %1984 = vrcp.f32 %v1064_v60 }
 0xf9b   :  { %1986 = vrcp.f32 %v1090_v61 }
 0xfa4   :  { %v1985_v62 = vpop.eup %1984 }
 0xfa5   :  { %v1987_v50 = vpop.eup %1986  ;;  %v1067_v63 = vmul.f32 2.0, %v1985_v62  ;;  %v1069_v11 = vmul.f32 %v1985_v62, %v943_v33 }
 0xfa6   :  { %v1093_v1 = vmul.f32 2.0, %v1987_v50  ;;  %v1095_v14 = vmul.f32 %v1987_v50, %v969_v36 }
 0xfa7   :  { %v1670_v2 = vadd.f32 -1.0, %v1067_v63 }
 0xfa8   :  { %v1672_v4 = vadd.f32 -1.0, %v1093_v1 }
 0xfa9   :  { %1071 = vrot.lane.b32.xlu1 %v1670_v2, %s2090_s1 }
 0xfaa   :  { %1097 = vrot.lane.b32.xlu0 %v1672_v4, %s2090_s1 }
0x101b   :  { %v1072_v52 = vpop.permute.xlu1 %1071 }
0x101c   :  { %v1074_v5 = vmul.f32 %v1985_v62, %v1072_v52  ;;  %v1098_v7 = vpop.permute.xlu0 %1097 }
0x101d   :  { %v1100_v10 = vmul.f32 %v1987_v50, %v1098_v7 }
0x101e   :  { %1076 = vrot.lane.b32.xlu1 %v1074_v5, %s2088_s9 }
0x101f   :  { %1102 = vrot.lane.b32.xlu0 %v1100_v10, %s2088_s9 }
0x1090   :  { %v1077_v12 = vpop.permute.xlu1 %1076 }
0x1091   :  { %v1079_v15 = vadd.f32 %v1077_v12, %v1069_v11  ;;  %v1103_v16 = vpop.permute.xlu0 %1102 }
0x1092   :  { %v1105_v53 = vadd.f32 %v1103_v16, %v1095_v14 }
0x1093   :  { %1988 = vtanh.f32 %v1079_v15 }
0x1094   :  { %1990 = vtanh.f32 %v1105_v53 }
0x109d   :  { %v1989_v17 = vpop.eup %1988 }
0x109e   :  { %v1991_v19 = vpop.eup %1990  ;;  %1082 = vrot.lane.b32.xlu1 %v1989_v17, %s2090_s1 }
0x109f   :  { %1108 = vrot.lane.b32.xlu0 %v1991_v19, %s2090_s1 }
0x1110   :  { %v1083_v20 = vpop.permute.xlu1 %1082 }
0x1111   :  { %v1085_v21 = vmul.f32 %v1985_v62, %v1083_v20  ;;  %v1109_v9 = vpop.permute.xlu0 %1108 }
0x1112   :  { %v1111_v24 = vmul.f32 %v1987_v50, %v1109_v9 }
0x1113   :  { %1113 = vrot.lane.b32.xlu1 %v1085_v21, %s2088_s9 }
0x1114   :  { %1117 = vrot.lane.b32.xlu0 %v1111_v24, %s2090_s1 }
0x1185   :  { %v1114_v25 = vpop.permute.xlu1 %1113 }
0x1186   :  { %v1118_v54 = vpop.permute.xlu0 %1117 }
0x1187   :  { %v1120_v26 = vsel %vm334_vm6, %v1114_v25, %v1118_v54 }
0x1188   :  { %1673 = vmatmul.mubr.msk.f32.vlgmr.msra.gmra.mrb[6].mxu1 %vm74_vm0, %v1120_v26 }
0x1189   :  { %1895 = vmatpush1.bf16.msra.mxu1 %v2166_v13  ;;  %1460 = vmatprep.mubr.f32.mxu1 %v2089_v8 }
0x118a   :  { %1897 = vmatprep.subr.bf16.mxu1 %v2171_v18 }
0x118d   :  { %1899 = vmatpush1.bf16.msra.mxu1 %v2179_v23 }
0x118e   :  { %1901 = vmatprep.subr.bf16.mxu1 %v2182_v28 }
0x1191   :  { %1903 = vmatpush1.bf16.msra.mxu1 %v2185_v35 }
0x1192   :  { %1905 = vmatprep.subr.bf16.mxu1 %v2194_v40 }
0x1195   :  { %1907 = vmatpush1.bf16.msra.mxu1 %v2206_v47 }
0x125b   :  { %v1190_v27 = vpop.f32.mrb[6].mxu1 }
0x125c   :  { %v1196_v29 = vadd.f32 %v1190_v27, %v2326_v56  ;;  %v1192_v30 = vpop.f32.mrb[7].mxu1 }
0x125d   :  { %v1222_v13 = vadd.f32 %v1192_v30, %v2340_v51 }
0x125e   :  { %v1674_v31 = vmul.f32 -1.442695, %v1196_v29 }
0x125f   :  { %v1676_v32 = vmul.f32 -1.442695, %v1222_v13 }
0x1260   :  { %1992 = vpow2.f32 %v1674_v31 }
0x1261   :  { %1994 = vpow2.f32 %v1676_v32 }
0x126a   :  { %v1993_v18 = vpop.eup %1992 }
0x126b   :  { %v1995_v23 = vpop.eup %1994  ;;  %v1200_v33 = vadd.f32 1.0, %v1993_v18  ;;  %v1569_v18 = vshrl.u32 %v83_v3, 7 }
0x126c   :  { %v1226_v28 = vadd.f32 1.0, %v1995_v23 }
0x126d   :  { %1996 = vrcp.f32 %v1200_v33  ;;  %vm1570_vm1 = vcmp.lt.s32.totalorder %v1569_v18, 2 }
0x126e   :  { %1998 = vrcp.f32 %v1226_v28  ;;  %v1687_v23 = vsel %vm1570_vm1, 1.0, %v2089_v8 }
0x1277   :  { %v1997_v35 = vpop.eup %1996 }
0x1278   :  { %v1999_v40 = vpop.eup %1998  ;;  %v1203_v34 = vmul.f32 2.0, %v1997_v35  ;;  %v1205_v39 = vmul.f32 %v1997_v35, %v1079_v15 }
0x1279   :  { %v1229_v47 = vmul.f32 2.0, %v1999_v40  ;;  %v1231_v49 = vmul.f32 %v1999_v40, %v1105_v53 }
0x127a   :  { %v1675_v36 = vadd.f32 -1.0, %v1203_v34 }
0x127b   :  { %v1677_v0 = vadd.f32 -1.0, %v1229_v47 }
0x127c   :  { %1207 = vrot.lane.b32.xlu1 %v1675_v36, %s2090_s1 }
0x127d   :  { %1233 = vrot.lane.b32.xlu0 %v1677_v0, %s2090_s1 }
0x12ee   :  { %v1208_v56 = vpop.permute.xlu1 %1207 }
0x12ef   :  { %v1210_v6 = vmul.f32 %v1997_v35, %v1208_v56  ;;  %v1234_v37 = vpop.permute.xlu0 %1233 }
0x12f0   :  { %v1236_v38 = vmul.f32 %v1999_v40, %v1234_v37 }
0x12f1   :  { %1212 = vrot.lane.b32.xlu1 %v1210_v6, %s2088_s9 }
0x12f2   :  { %1238 = vrot.lane.b32.xlu0 %v1236_v38, %s2088_s9 }
0x1363   :  { %v1213_v41 = vpop.permute.xlu1 %1212 }
0x1364   :  { %v1215_v42 = vadd.f32 %v1213_v41, %v1205_v39  ;;  %v1239_v43 = vpop.permute.xlu0 %1238 }
0x1365   :  { %v1241_v22 = vadd.f32 %v1239_v43, %v1231_v49 }
0x1366   :  { %2000 = vtanh.f32 %v1215_v42 }
0x1367   :  { %2002 = vtanh.f32 %v1241_v22 }
0x1370   :  { %v2001_v44 = vpop.eup %2000 }
0x1371   :  { %v2003_v45 = vpop.eup %2002  ;;  %1218 = vrot.lane.b32.xlu1 %v2001_v44, %s2090_s1 }
0x1372   :  { %1244 = vrot.lane.b32.xlu0 %v2003_v45, %s2090_s1  ;;  %v68_v45 = vld [vmem:[#allocation8 + $0x88] sm:$0xff] }
0x13e3   :  { %v1219_v46 = vpop.permute.xlu1 %1218 }
0x13e4   :  { %v1221_v48 = vmul.f32 %v1997_v35, %v1219_v46  ;;  %v1245_v57 = vpop.permute.xlu0 %1244  ;;  %v70_v46 = vld [vmem:[#allocation8 + $0xa8] sm:$0xff] }
0x13e5   :  { %v1247_v58 = vmul.f32 %v1999_v40, %v1245_v57 }
0x13e6   :  { %1249 = vrot.lane.b32.xlu1 %v1221_v48, %s2088_s9  ;;  %v2091_v48 = vmov 0.0|0.0  }
0x13e7   :  { %1253 = vrot.lane.b32.xlu0 %v1247_v58, %s2090_s1  ;;  %1908 = vmatprep.subr.bf16.mxu0 %v2091_v48  ;;  %v71_v58 = vld [vmem:[#allocation8 + $0xb8] sm:$0xff] }
0x1458   :  { %v1250_v59 = vpop.permute.xlu1 %1249 }
0x1459   :  { %v1254_v60 = vpop.permute.xlu0 %1253 }
0x145a   :  { %v1256_v61 = vsel %vm334_vm6, %v1250_v59, %v1254_v60  ;;  %v1912_v59 = vpack.c.bf16 %v71_v58, %v70_v46 }
0x145b   :  { %1678 = vmatmul.mubr.msk.f32.vlgmr.msra.gmra.mrb[14].mxu0 %vm74_vm0, %v1256_v61 }
0x145c   :  { %1745 = vmatprep.mubr.msk.f32.mxu0 %vm2092_vm5, %v2089_v8 }
0x152e   :  { %v1326_v62 = vpop.f32.mrb[14].mxu0 }
0x152f   :  { %v1332_v50 = vadd.f32 %v2324_v55, %v1326_v62  ;;  %v1328_v63 = vpop.f32.mrb[15].mxu0 }
0x1530   :  { %v1358_v1 = vadd.f32 %v1328_v63, %v2340_v51 }
0x1531   :  { %v1679_v2 = vmul.f32 -1.442695, %v1332_v50 }
0x1532   :  { %v1681_v4 = vmul.f32 -1.442695, %v1358_v1 }
0x1533   :  { %2004 = vpow2.f32 %v1679_v2 }
0x1534   :  { %2006 = vpow2.f32 %v1681_v4 }
0x153d   :  { %v2005_v52 = vpop.eup %2004 }
0x153e   :  { %v2007_v5 = vpop.eup %2006  ;;  %v1336_v7 = vadd.f32 1.0, %v2005_v52 }
0x153f   :  { %v1362_v10 = vadd.f32 1.0, %v2007_v5 }
0x1540   :  { %2008 = vrcp.f32 %v1336_v7 }
0x1541   :  { %2010 = vrcp.f32 %v1362_v10 }
0x154a   :  { %v2009_v11 = vpop.eup %2008 }
0x154b   :  { %v2011_v12 = vpop.eup %2010  ;;  %v1339_v14 = vmul.f32 2.0, %v2009_v11  ;;  %v1341_v21 = vmul.f32 %v2009_v11, %v1215_v42 }
0x154c   :  { %v1365_v15 = vmul.f32 2.0, %v2011_v12  ;;  %v1367_v24 = vmul.f32 %v2011_v12, %v1241_v22 }
0x154d   :  { %v1680_v16 = vadd.f32 -1.0, %v1339_v14 }
0x154e   :  { %v1682_v53 = vadd.f32 -1.0, %v1365_v15 }
0x154f   :  { %1343 = vrot.lane.b32.xlu1 %v1680_v16, %s2090_s1 }
0x1550   :  { %1369 = vrot.lane.b32.xlu0 %v1682_v53, %s2090_s1 }
0x15c1   :  { %v1344_v55 = vpop.permute.xlu1 %1343 }
0x15c2   :  { %v1346_v17 = vmul.f32 %v2009_v11, %v1344_v55  ;;  %v1370_v19 = vpop.permute.xlu0 %1369 }
0x15c3   :  { %v1372_v20 = vmul.f32 %v2011_v12, %v1370_v19 }
0x15c4   :  { %1348 = vrot.lane.b32.xlu1 %v1346_v17, %s2088_s9 }
0x15c5   :  { %1374 = vrot.lane.b32.xlu0 %v1372_v20, %s2088_s9 }
0x1636   :  { %v1349_v9 = vpop.permute.xlu1 %1348 }
0x1637   :  { %v1351_v25 = vadd.f32 %v1349_v9, %v1341_v21  ;;  %v1375_v54 = vpop.permute.xlu0 %1374 }
0x1638   :  { %v1377_v26 = vadd.f32 %v1375_v54, %v1367_v24 }
0x1639   :  { %2012 = vtanh.f32 %v1351_v25 }
0x163a   :  { %2014 = vtanh.f32 %v1377_v26 }
0x1643   :  { %v2013_v27 = vpop.eup %2012 }
0x1644   :  { %v2015_v29 = vpop.eup %2014  ;;  %1354 = vrot.lane.b32.xlu1 %v2013_v27, %s2090_s1 }
0x1645   :  { %1380 = vrot.lane.b32.xlu0 %v2015_v29, %s2090_s1 }
0x16b6   :  { %v1355_v30 = vpop.permute.xlu1 %1354 }
0x16b7   :  { %v1357_v13 = vmul.f32 %v2009_v11, %v1355_v30  ;;  %v1381_v31 = vpop.permute.xlu0 %1380 }
0x16b8   :  { %v1383_v32 = vmul.f32 %v2011_v12, %v1381_v31 }
0x16b9   :  { %1385 = vrot.lane.b32.xlu1 %v1357_v13, %s2088_s9 }
0x16ba   :  { %1389 = vrot.lane.b32.xlu0 %v1383_v32, %s2090_s1 }
0x172b   :  { %v1386_v33 = vpop.permute.xlu1 %1385 }
0x172c   :  { %v1573_v28 = vsel %vm334_vm6, %v1386_v33, %v1351_v25  ;;  %v1390_v35 = vpop.permute.xlu0 %1389 }
0x172d   :  { %v1574_v40 = vsel %vm74_vm0, %v1573_v28, 0.0  ;;  %v1392_v34 = vsel %vm334_vm6, %v1386_v33, %v1390_v35 }
0x172e   :  { %v1575_v47 = vmul.f32 %v1687_v23, %v1574_v40  ;;  %1683 = vmatmul.mubr.msk.f32.vlgmr.msra.gmra.mrb[8].mxu1 %vm74_vm0, %v1392_v34 }
0x1730   :  { %1576 = vst [vmem:[#allocation9] sm:$0xff] %v1575_v47 }
0x1801   :  { %v1462_v36 = vpop.f32.mrb[8].mxu1 }
0x1802   :  { %v1463_v0 = vpop.f32.mrb[9].mxu1 }
0x1803   :  { %v1466_v56 = vadd.f32 %v1463_v0, %v2340_v51  ;;  %v69_v51 = vld [vmem:[#allocation8 + $0x98] sm:$0xff] }
0x1804   :  { %v1909_v57 = vpack.c.bf16 %v69_v51, %v68_v45 }
0x1805   :  { %v1684_v3 = vmul.f32 -1.442695, %v1466_v56 }
0x1806   :  { %1910 = vmatpush3.bf16.msra.mxu0 %v1909_v57 }
0x1807   :  { %2016 = vpow2.f32 %v1684_v3  ;;  %1911 = vmatprep.subr.bf16.mxu0 %v2091_v48 }
0x180a   :  { %1913 = vmatpush3.bf16.msra.mxu0 %v1912_v59 }
0x1811   :  { %v2017_v6 = vpop.eup %2016 }
0x1812   :  { %v1470_v37 = vadd.f32 1.0, %v2017_v6 }
0x1814   :  { %2018 = vrcp.f32 %v1470_v37 }
0x181e   :  { %v2019_v38 = vpop.eup %2018 }
0x181f   :  { %v1473_v39 = vmul.f32 2.0, %v2019_v38  ;;  %v1475_v43 = vmul.f32 %v2019_v38, %v1377_v26 }
0x1821   :  { %v1685_v41 = vadd.f32 -1.0, %v1473_v39 }
0x1823   :  { %1477 = vrot.lane.b32.xlu1 %v1685_v41, %s2090_s1 }
0x1895   :  { %v1478_v49 = vpop.permute.xlu1 %1477 }
0x1896   :  { %v1480_v42 = vmul.f32 %v2019_v38, %v1478_v49 }
0x1898   :  { %1482 = vrot.lane.b32.xlu0 %v1480_v42, %s2088_s9 }
0x190a   :  { %v1483_v22 = vpop.permute.xlu0 %1482 }
0x190b   :  { %v1485_v44 = vadd.f32 %v1483_v22, %v1475_v43 }
0x190d   :  { %2020 = vtanh.f32 %v1485_v44 }
0x1917   :  { %v2021_v60 = vpop.eup %2020 }
0x1918   :  { %1488 = vrot.lane.b32.xlu1 %v2021_v60, %s2090_s1 }
0x198a   :  { %v1489_v61 = vpop.permute.xlu1 %1488 }
0x198b   :  { %v1491_v62 = vmul.f32 %v2019_v38, %v1489_v61 }
0x198d   :  { %1493 = vrot.lane.b32.xlu0 %v1491_v62, %s2088_s9 }
0x19ff   :  { %v1494_v50 = vpop.permute.xlu0 %1493 }
0x1a00   :  { %v1578_v63 = vsel %vm334_vm6, %v1494_v50, %v1485_v44  ;;  %1746 = vmatmul.mubr.msk.f32.vlgmr.msra.gmra.mrb[16].mxu0 %vm334_vm6, %v1494_v50 }
0x1a01   :  { %v1579_v1 = vsel %vm74_vm0, %v1578_v63, 0.0 }
0x1a02   :  { %v1580_v2 = vmul.f32 %v1687_v23, %v1579_v1 }
0x1a04   :  { %1582 = vst [vmem:[#allocation9 + $0x8] sm:$0xff] %v1580_v2 }
0x1a05   :  { %2067 = shalt.err (!%p2064_p3)
}
0x1a06   :  { %s2068_s5 = scalar_lea.hbm %s2503_s4, 256 }
0x1a07   :  { %p2069_p4 = scmp.ne.s32.totalorder %s2503_s4, %s2068_s5  ;;  %p2072_p5 = scmp.lt.u32.totalorder %s2068_s5, %s2503_s4 }
0x1a09   :  { %p2074_p6 = pnand %p2072_p5, %p2069_p4 }
0x1a0b   :  { %2077 = shalt.err (!%p2074_p6)
}
0x1a0c   :  { %s2094_s2 = smov 128   ;;  %s2095_s10 = smov 8   ;;  %v73_v8 = vld [vmem:[#allocation8 + $0x108] ss:$0 sm:$0xff] }
0x1a0d   :  { %1596 = dma.vmem_to_hbm [thread:$0]  %s1591_s27, 256, %s2503_s4, [#allocation6], %s2094_s2, %s2094_s2, %s2095_s10  }
0x1ad3   :  { %v1563_v4 = vpop.f32.mrb[16].mxu0 }
0x1ad4   :  { %v1564_v52 = vadd.f32 %v1563_v4, %v73_v8  ;;  %v1747_v5 = vpop.f32.mrb[17].mxu0 }
0x1ad6   :  { %1567 = vst [vmem:[%s2502_s3] sm:$0xff] %v1564_v52 }
0x1ad7   :  { %2082 = dma.done.wait [#allocation6], 256  }
0x1ad8   :  { %2083 = vsyncadd [#allocation6], 4294967040 }
0x1ad9   :  { %1602 = vsyncpa [#allocation5], 1 }
0x1ada   :  { %1603 = vsyncpa [#allocation6], 1 }
0x1adb   :  { %1604 = vsyncpa [#allocation7], 1 }

</bundles_post_ra>
